<compile_context>
chip_gen: v7x
topology: tpu7x:2x2x1
jax: 0.10.0
libtpu: 0.0.40
codegen_flags: <defaults>
</compile_context>

<pallas_src>
import functools

import jax
import jax.numpy as jnp
from jax.experimental import pallas as pl
from jax.experimental.pallas import tpu as pltpu

_EPS = 1e-5


def _rdb_kernel(H, W, nIn, n, nd, *refs):
    """One image per grid step.  refs = (x, w0, wd[nd], b[nd], sf, bf, a, o, feat)."""
    HW = H * W
    x_ref = refs[0]
    w0_ref = refs[1]
    wd_refs = refs[2:2 + nd]
    b_refs = refs[2 + nd:2 + 2 * nd]
    sf_ref = refs[2 + 2 * nd]
    bf_ref = refs[3 + 2 * nd]
    a_ref = refs[4 + 2 * nd]
    o_ref = refs[5 + 2 * nd]
    feat_ref = refs[6 + 2 * nd]          # VMEM scratch (nIn, HW) f32

    # Column masks for the horizontal (dx) taps of the 3x3 conv.
    col = jax.lax.broadcasted_iota(jnp.int32, (1, HW), 1) % W
    not_first_col = col != 0             # valid when reading x-1
    not_last_col = col != (W - 1)        # valid when reading x+1

    xv = x_ref[0]                        # (nIn, HW) f32, kept for the residual

    # 1x1 conv (nIn -> n): single bf16 matmul, lane-dense N = HW.
    feat0 = jnp.dot(w0_ref[...], xv.astype(jnp.bfloat16),
                    preferred_element_type=jnp.float32)
    feat_ref[0:n, :] = feat0

    # Dense layers: im2col -> one matmul (K = 9*Cin) -> folded-BN bias -> ReLU.
    for l in range(nd):
        cin = (l + 1) * n
        fcur = feat_ref[0:cin, :]                                   # (cin, HW)
        zpad = jnp.zeros((cin, W + 1), jnp.float32)
        fpad = jnp.concatenate([zpad, fcur, zpad], axis=1)          # (cin, HW+2W+2)
        parts = []
        for dy in range(3):
            for dx in range(3):
                s = dy * W + dx
                win = fpad[:, s:s + HW]                             # lane-shifted view
                if dx == 0:
                    win = jnp.where(not_first_col, win, 0.0)
                elif dx == 2:
                    win = jnp.where(not_last_col, win, 0.0)
                parts.append(win)
        slab = jnp.concatenate(parts, axis=0).astype(jnp.bfloat16)  # (9*cin, HW)
        y = jnp.dot(wd_refs[l][...], slab,                          # BN scale pre-folded
                    preferred_element_type=jnp.float32)             # (n, HW)
        y = jnp.maximum(y + b_refs[l][...], 0.0)                    # folded BN bias + ReLU
        feat_ref[cin:cin + n, :] = y

    # Residual add, final folded BN, per-channel PReLU; lane-dense store.
    combine = xv + feat_ref[...]
    z = combine * sf_ref[...] + bf_ref[...]
    out = jnp.where(z >= 0.0, z, z * a_ref[...])
    o_ref[0] = out.astype(o_ref.dtype)


def _fold_bn(gamma, beta, mean, var):
    scale = gamma / jnp.sqrt(var + _EPS)
    return scale, beta - mean * scale


def residual_dense_block(x_nchw, raw):
    """Forward pass matching ResidualDenseBlock(nIn, s=4, add=True)."""
    N, C, H, W = x_nchw.shape
    n = raw["w0_oihw"].shape[0]
    nd = len(raw["wd_oihw"])             # s - 1 dense layers
    assert C == n * (nd + 1), "residual add requires nIn == s * n"
    HW = H * W

    # Parameter plumbing (plain JAX glue, runs once outside the kernel).
    w0 = raw["w0_oihw"].reshape(n, C).astype(jnp.bfloat16)          # (n, C)
    wds, bs = [], []
    for w, bn in zip(raw["wd_oihw"], raw["bn_dense"]):
        cin = w.shape[1]
        scale, bias = _fold_bn(*bn)
        wf = jnp.transpose(w, (0, 2, 3, 1)).reshape(n, 9 * cin)     # (n, 9*Cin) HWIO taps
        wds.append((wf * scale[:, None]).astype(jnp.bfloat16))      # BN scale folded
        bs.append(bias.reshape(n, 1).astype(jnp.float32))
    sf, bf = _fold_bn(*raw["bn_final"])
    sf = sf.reshape(C, 1).astype(jnp.float32)
    bf = bf.reshape(C, 1).astype(jnp.float32)
    a = raw["prelu"].reshape(C, 1).astype(jnp.float32)

    x = x_nchw.reshape(N, C, HW)          # contiguous reshape, no transpose
    params = [w0] + wds + bs + [sf, bf, a]

    def full_spec(arr):
        return pl.BlockSpec(arr.shape, lambda b, _nd=arr.ndim: (0,) * _nd)

    kernel = functools.partial(_rdb_kernel, H, W, C, n, nd)
    out = pl.pallas_call(
        kernel,
        out_shape=jax.ShapeDtypeStruct((N, C, HW), x.dtype),
        grid=(N,),
        in_specs=([pl.BlockSpec((1, C, HW), lambda b: (b, 0, 0))]
                  + [full_spec(p) for p in params]),
        out_specs=pl.BlockSpec((1, C, HW), lambda b: (b, 0, 0)),
        scratch_shapes=[pltpu.VMEM((C, HW), jnp.float32)],
        compiler_params=pltpu.CompilerParams(dimension_semantics=("parallel",)),
    )(x, *params)
    return out.reshape(N, C, H, W)


def init_raw_params(key, nIn, s=4):
    """Deterministic synthetic parameters with the shapes implied by __init__."""
    n = nIn // s
    ks = list(jax.random.split(key, 16))

    def conv_w(k, cout, cin, kh, kw):
        fan_in = cin * kh * kw
        return jax.random.normal(k, (cout, cin, kh, kw), jnp.float32) / jnp.sqrt(fan_in)

    def bn_p(k, c):
        k1, k2, k3, k4 = jax.random.split(k, 4)
        gamma = 1.0 + 0.1 * jax.random.normal(k1, (c,), jnp.float32)
        beta = 0.1 * jax.random.normal(k2, (c,), jnp.float32)
        mean = 0.1 * jax.random.normal(k3, (c,), jnp.float32)
        var = 0.5 + jnp.abs(jax.random.normal(k4, (c,), jnp.float32))
        return (gamma, beta, mean, var)

    return {
        "w0_oihw": conv_w(ks[0], n, nIn, 1, 1),
        "wd_oihw": [conv_w(ks[1 + i], n, (i + 1) * n, 3, 3) for i in range(s - 1)],
        "bn_dense": [bn_p(ks[4 + i], n) for i in range(s - 1)],
        "bn_final": bn_p(ks[7], nIn),
        "prelu": jnp.full((nIn,), 0.25, jnp.float32),  # PyTorch PReLU(nIn) default
    }


def _reference(x_nchw, raw):
    """Plain-JAX NCHW f32 reference (inference-mode BN), for correctness check."""
    def bn_apply(x, g, b, m, v):
        s = g / jnp.sqrt(v + _EPS)
        return x * s[None, :, None, None] + (b - m * s)[None, :, None, None]

    def conv(x, w, pad):
        return jax.lax.conv_general_dilated(
            x, w, window_strides=(1, 1), padding=[(pad, pad), (pad, pad)],
            dimension_numbers=("NCHW", "OIHW", "NCHW"))

    inter = conv(x_nchw, raw["w0_oihw"], 0)
    feat = inter
    for i in range(len(raw["wd_oihw"])):
        y = conv(feat, raw["wd_oihw"][i], 1)
        y = jnp.maximum(bn_apply(y, *raw["bn_dense"][i]), 0.0)
        feat = jnp.concatenate([feat, y], axis=1)
    combine = x_nchw + feat
    z = bn_apply(combine, *raw["bn_final"])
    a = raw["prelu"]
    return jnp.where(z >= 0, z, z * a[None, :, None, None])


if __name__ == "__main__":
    key = jax.random.PRNGKey(0)
    kx, kp = jax.random.split(key)

    N, nIn, H, W = 2, 16, 16, 16   # nIn divisible by s=4 -> n=4; H*W = 256 lanes
    x = jax.random.normal(kx, (N, nIn, H, W), jnp.float32)
    raw = init_raw_params(kp, nIn, s=4)

    out = residual_dense_block(x, raw)
    out = jax.block_until_ready(out)

    ref = _reference(x, raw)
    assert out.shape == ref.shape == (N, nIn, H, W)
    # bf16 MXU operands with f32 accumulation -> tolerance sized accordingly.
    assert jnp.allclose(out, ref, atol=2e-2, rtol=2e-2), float(
        jnp.max(jnp.abs(out - ref)))

    print("KERNEL_OK")
</pallas_src>

<mosaic_0001>
module attributes {stable_mosaic.version = 11 : i64} {
  func.func @_rdb_kernel(%arg0: i32, %arg1: memref<1x16x256xf32, #tpu.memory_space<vmem>>, %arg2: memref<4x16xbf16, #tpu.memory_space<vmem>>, %arg3: memref<4x36xbf16, #tpu.memory_space<vmem>>, %arg4: memref<4x72xbf16, #tpu.memory_space<vmem>>, %arg5: memref<4x108xbf16, #tpu.memory_space<vmem>>, %arg6: memref<4x1xf32, #tpu.memory_space<vmem>>, %arg7: memref<4x1xf32, #tpu.memory_space<vmem>>, %arg8: memref<4x1xf32, #tpu.memory_space<vmem>>, %arg9: memref<16x1xf32, #tpu.memory_space<vmem>>, %arg10: memref<16x1xf32, #tpu.memory_space<vmem>>, %arg11: memref<16x1xf32, #tpu.memory_space<vmem>>, %arg12: memref<1x16x256xf32, #tpu.memory_space<vmem>>, %arg13: memref<16x256xf32, #tpu.memory_space<vmem>>) attributes {dimension_semantics = [#tpu.dimension_semantics<parallel>], iteration_bounds = array<i64: 2>, scalar_prefetch = 0 : i64, scratch_operands = 1 : i64, tpu.core_type = #tpu.core_type<tc>, window_params = [{transform_indices = @transform_0, window_bounds = array<i64: 1, 16, 256>}, {pipeline_mode = #tpu.pipeline_mode<synchronous>, transform_indices = @transform_1, window_bounds = array<i64: 4, 16>}, {pipeline_mode = #tpu.pipeline_mode<synchronous>, transform_indices = @transform_2, window_bounds = array<i64: 4, 36>}, {pipeline_mode = #tpu.pipeline_mode<synchronous>, transform_indices = @transform_3, window_bounds = array<i64: 4, 72>}, {pipeline_mode = #tpu.pipeline_mode<synchronous>, transform_indices = @transform_4, window_bounds = array<i64: 4, 108>}, {pipeline_mode = #tpu.pipeline_mode<synchronous>, transform_indices = @transform_5, window_bounds = array<i64: 4, 1>}, {pipeline_mode = #tpu.pipeline_mode<synchronous>, transform_indices = @transform_6, window_bounds = array<i64: 4, 1>}, {pipeline_mode = #tpu.pipeline_mode<synchronous>, transform_indices = @transform_7, window_bounds = array<i64: 4, 1>}, {pipeline_mode = #tpu.pipeline_mode<synchronous>, transform_indices = @transform_8, window_bounds = array<i64: 16, 1>}, {pipeline_mode = #tpu.pipeline_mode<synchronous>, transform_indices = @transform_9, window_bounds = array<i64: 16, 1>}, {pipeline_mode = #tpu.pipeline_mode<synchronous>, transform_indices = @transform_10, window_bounds = array<i64: 16, 1>}, {transform_indices = @transform_11, window_bounds = array<i64: 1, 16, 256>}]} {
    %0 = tpu.iota {dimensions = array<i32: 1>} : vector<1x256xi32>
    %c16_i32 = arith.constant 16 : i32
    %c0_i32 = arith.constant 0 : i32
    %1 = arith.cmpi eq, %c16_i32, %c0_i32 : i32
    %c1_i32 = arith.constant 1 : i32
    %2 = arith.select %1, %c1_i32, %c16_i32 : i32
    %3 = vector.broadcast %2 : i32 to vector<1x256xi32>
    %4 = arith.remsi %0, %3 : vector<1x256xi32>
    %c0_i32_0 = arith.constant 0 : i32
    %5 = vector.broadcast %c0_i32_0 : i32 to vector<1x256xi32>
    %6 = arith.cmpi ne, %4, %5 : vector<1x256xi32>
    %c0_i32_1 = arith.constant 0 : i32
    %7 = vector.broadcast %c0_i32_1 : i32 to vector<1x256xi32>
    %8 = arith.cmpi slt, %4, %7 : vector<1x256xi32>
    %c0_i32_2 = arith.constant 0 : i32
    %9 = arith.cmpi slt, %2, %c0_i32_2 : i32
    %10 = vector.broadcast %9 : i1 to vector<1x256xi1>
    %11 = vector.broadcast %10 : vector<1x256xi1> to vector<1x256xi1>
    %12 = arith.xori %8, %11 : vector<1x256xi1>
    %13 = arith.andi %12, %6 : vector<1x256xi1>
    %14 = vector.broadcast %2 : i32 to vector<1x256xi32>
    %15 = arith.addi %4, %14 : vector<1x256xi32>
    %16 = arith.select %13, %15, %4 : vector<1x256xi1>, vector<1x256xi32>
    %c0_i32_3 = arith.constant 0 : i32
    %17 = vector.broadcast %c0_i32_3 : i32 to vector<1x256xi32>
    %18 = arith.cmpi ne, %16, %17 : vector<1x256xi32>
    %c15_i32 = arith.constant 15 : i32
    %19 = vector.broadcast %c15_i32 : i32 to vector<1x256xi32>
    %20 = arith.cmpi ne, %16, %19 : vector<1x256xi32>
    %c0 = arith.constant 0 : index
    %c0_4 = arith.constant 0 : index
    %c0_5 = arith.constant 0 : index
    %21 = vector.load %arg1[%c0, %c0_4, %c0_5] : memref<1x16x256xf32, #tpu.memory_space<vmem>>, vector<1x16x256xf32>
    %22 = vector.shape_cast %21 : vector<1x16x256xf32> to vector<16x256xf32>
    %c0_6 = arith.constant 0 : index
    %c0_7 = arith.constant 0 : index
    %23 = vector.load %arg2[%c0_6, %c0_7] : memref<4x16xbf16, #tpu.memory_space<vmem>>, vector<4x16xbf16>
    %24 = arith.truncf %22 : vector<16x256xf32> to vector<16x256xbf16>
    %cst = arith.constant dense<0.000000e+00> : vector<4x256xf32>
    %25 = tpu.matmul %23, %24, %cst {dimension_numbers = #tpu.dot_dimension_numbers<[1], [0], [0], [1], [0, 0, 1, 1], [], []>} : vector<4x16xbf16>, vector<16x256xbf16>, vector<4x256xf32> -> vector<4x256xf32>
    %c0_8 = arith.constant 0 : index
    %c0_9 = arith.constant 0 : index
    %26 = vector.load %arg13[%c0_8, %c0_9] : memref<16x256xf32, #tpu.memory_space<vmem>>, vector<4x256xf32>
    tpu.vector_store %arg13[%c0_8, %c0_9], %25 {strides = array<i32>} : memref<16x256xf32, #tpu.memory_space<vmem>>, vector<4x256xf32>,
    %c0_10 = arith.constant 0 : index
    %c0_11 = arith.constant 0 : index
    %27 = vector.load %arg13[%c0_10, %c0_11] : memref<16x256xf32, #tpu.memory_space<vmem>>, vector<4x256xf32>
    %cst_12 = arith.constant 0.000000e+00 : f32
    %28 = vector.broadcast %cst_12 : f32 to vector<4x17xf32>
    %29 = tpu.concatenate %28, %27, %28 in 1 : vector<4x17xf32>, vector<4x256xf32>, vector<4x17xf32> -> vector<4x290xf32>
    %30 = vector.extract_strided_slice %29 {offsets = [0, 0], sizes = [4, 256], strides = [1, 1]} : vector<4x290xf32> to vector<4x256xf32>
    %cst_13 = arith.constant 0.000000e+00 : f32
    %31 = vector.shape_cast %18 : vector<1x256xi1> to vector<1x256xi1>
    %32 = vector.broadcast %31 : vector<1x256xi1> to vector<4x256xi1>
    %33 = vector.broadcast %cst_13 : f32 to vector<4x256xf32>
    %34 = arith.select %32, %30, %33 : vector<4x256xi1>, vector<4x256xf32>
    %35 = vector.extract_strided_slice %29 {offsets = [0, 1], sizes = [4, 256], strides = [1, 1]} : vector<4x290xf32> to vector<4x256xf32>
    %36 = vector.extract_strided_slice %29 {offsets = [0, 2], sizes = [4, 256], strides = [1, 1]} : vector<4x290xf32> to vector<4x256xf32>
    %cst_14 = arith.constant 0.000000e+00 : f32
    %37 = vector.shape_cast %20 : vector<1x256xi1> to vector<1x256xi1>
    %38 = vector.broadcast %37 : vector<1x256xi1> to vector<4x256xi1>
    %39 = vector.broadcast %cst_14 : f32 to vector<4x256xf32>
    %40 = arith.select %38, %36, %39 : vector<4x256xi1>, vector<4x256xf32>
    %41 = vector.extract_strided_slice %29 {offsets = [0, 16], sizes = [4, 256], strides = [1, 1]} : vector<4x290xf32> to vector<4x256xf32>
    %cst_15 = arith.constant 0.000000e+00 : f32
    %42 = vector.shape_cast %18 : vector<1x256xi1> to vector<1x256xi1>
    %43 = vector.broadcast %42 : vector<1x256xi1> to vector<4x256xi1>
    %44 = vector.broadcast %cst_15 : f32 to vector<4x256xf32>
    %45 = arith.select %43, %41, %44 : vector<4x256xi1>, vector<4x256xf32>
    %46 = vector.extract_strided_slice %29 {offsets = [0, 17], sizes = [4, 256], strides = [1, 1]} : vector<4x290xf32> to vector<4x256xf32>
    %47 = vector.extract_strided_slice %29 {offsets = [0, 18], sizes = [4, 256], strides = [1, 1]} : vector<4x290xf32> to vector<4x256xf32>
    %cst_16 = arith.constant 0.000000e+00 : f32
    %48 = vector.shape_cast %20 : vector<1x256xi1> to vector<1x256xi1>
    %49 = vector.broadcast %48 : vector<1x256xi1> to vector<4x256xi1>
    %50 = vector.broadcast %cst_16 : f32 to vector<4x256xf32>
    %51 = arith.select %49, %47, %50 : vector<4x256xi1>, vector<4x256xf32>
    %52 = vector.extract_strided_slice %29 {offsets = [0, 32], sizes = [4, 256], strides = [1, 1]} : vector<4x290xf32> to vector<4x256xf32>
    %cst_17 = arith.constant 0.000000e+00 : f32
    %53 = vector.shape_cast %18 : vector<1x256xi1> to vector<1x256xi1>
    %54 = vector.broadcast %53 : vector<1x256xi1> to vector<4x256xi1>
    %55 = vector.broadcast %cst_17 : f32 to vector<4x256xf32>
    %56 = arith.select %54, %52, %55 : vector<4x256xi1>, vector<4x256xf32>
    %57 = vector.extract_strided_slice %29 {offsets = [0, 33], sizes = [4, 256], strides = [1, 1]} : vector<4x290xf32> to vector<4x256xf32>
    %58 = vector.extract_strided_slice %29 {offsets = [0, 34], sizes = [4, 256], strides = [1, 1]} : vector<4x290xf32> to vector<4x256xf32>
    %cst_18 = arith.constant 0.000000e+00 : f32
    %59 = vector.shape_cast %20 : vector<1x256xi1> to vector<1x256xi1>
    %60 = vector.broadcast %59 : vector<1x256xi1> to vector<4x256xi1>
    %61 = vector.broadcast %cst_18 : f32 to vector<4x256xf32>
    %62 = arith.select %60, %58, %61 : vector<4x256xi1>, vector<4x256xf32>
    %63 = tpu.concatenate %34, %35, %40, %45, %46, %51, %56, %57, %62 in 0 : vector<4x256xf32>, vector<4x256xf32>, vector<4x256xf32>, vector<4x256xf32>, vector<4x256xf32>, vector<4x256xf32>, vector<4x256xf32>, vector<4x256xf32>, vector<4x256xf32> -> vector<36x256xf32>
    %64 = arith.truncf %63 : vector<36x256xf32> to vector<36x256xbf16>
    %c0_19 = arith.constant 0 : index
    %c0_20 = arith.constant 0 : index
    %65 = vector.load %arg3[%c0_19, %c0_20] : memref<4x36xbf16, #tpu.memory_space<vmem>>, vector<4x36xbf16>
    %cst_21 = arith.constant dense<0.000000e+00> : vector<4x256xf32>
    %66 = tpu.matmul %65, %64, %cst_21 {dimension_numbers = #tpu.dot_dimension_numbers<[1], [0], [0], [1], [0, 0, 1, 1], [], []>} : vector<4x36xbf16>, vector<36x256xbf16>, vector<4x256xf32> -> vector<4x256xf32>
    %c0_22 = arith.constant 0 : index
    %c0_23 = arith.constant 0 : index
    %67 = vector.load %arg6[%c0_22, %c0_23] : memref<4x1xf32, #tpu.memory_space<vmem>>, vector<4x1xf32>
    %68 = vector.broadcast %67 : vector<4x1xf32> to vector<4x256xf32>
    %69 = arith.addf %66, %68 : vector<4x256xf32>
    %cst_24 = arith.constant 0.000000e+00 : f32
    %70 = vector.broadcast %cst_24 : f32 to vector<4x256xf32>
    %71 = arith.maximumf %69, %70 : vector<4x256xf32>
    %c4 = arith.constant 4 : index
    %c0_25 = arith.constant 0 : index
    %72 = vector.load %arg13[%c4, %c0_25] : memref<16x256xf32, #tpu.memory_space<vmem>>, vector<4x256xf32>
    tpu.vector_store %arg13[%c4, %c0_25], %71 {strides = array<i32>} : memref<16x256xf32, #tpu.memory_space<vmem>>, vector<4x256xf32>,
    %c0_26 = arith.constant 0 : index
    %c0_27 = arith.constant 0 : index
    %73 = vector.load %arg13[%c0_26, %c0_27] : memref<16x256xf32, #tpu.memory_space<vmem>>, vector<8x256xf32>
    %cst_28 = arith.constant 0.000000e+00 : f32
    %74 = vector.broadcast %cst_28 : f32 to vector<8x17xf32>
    %75 = tpu.concatenate %74, %73, %74 in 1 : vector<8x17xf32>, vector<8x256xf32>, vector<8x17xf32> -> vector<8x290xf32>
    %76 = vector.extract_strided_slice %75 {offsets = [0, 0], sizes = [8, 256], strides = [1, 1]} : vector<8x290xf32> to vector<8x256xf32>
    %cst_29 = arith.constant 0.000000e+00 : f32
    %77 = vector.shape_cast %18 : vector<1x256xi1> to vector<1x256xi1>
    %78 = vector.broadcast %77 : vector<1x256xi1> to vector<8x256xi1>
    %79 = vector.broadcast %cst_29 : f32 to vector<8x256xf32>
    %80 = arith.select %78, %76, %79 : vector<8x256xi1>, vector<8x256xf32>
    %81 = vector.extract_strided_slice %75 {offsets = [0, 1], sizes = [8, 256], strides = [1, 1]} : vector<8x290xf32> to vector<8x256xf32>
    %82 = vector.extract_strided_slice %75 {offsets = [0, 2], sizes = [8, 256], strides = [1, 1]} : vector<8x290xf32> to vector<8x256xf32>
    %cst_30 = arith.constant 0.000000e+00 : f32
    %83 = vector.shape_cast %20 : vector<1x256xi1> to vector<1x256xi1>
    %84 = vector.broadcast %83 : vector<1x256xi1> to vector<8x256xi1>
    %85 = vector.broadcast %cst_30 : f32 to vector<8x256xf32>
    %86 = arith.select %84, %82, %85 : vector<8x256xi1>, vector<8x256xf32>
    %87 = vector.extract_strided_slice %75 {offsets = [0, 16], sizes = [8, 256], strides = [1, 1]} : vector<8x290xf32> to vector<8x256xf32>
    %cst_31 = arith.constant 0.000000e+00 : f32
    %88 = vector.shape_cast %18 : vector<1x256xi1> to vector<1x256xi1>
    %89 = vector.broadcast %88 : vector<1x256xi1> to vector<8x256xi1>
    %90 = vector.broadcast %cst_31 : f32 to vector<8x256xf32>
    %91 = arith.select %89, %87, %90 : vector<8x256xi1>, vector<8x256xf32>
    %92 = vector.extract_strided_slice %75 {offsets = [0, 17], sizes = [8, 256], strides = [1, 1]} : vector<8x290xf32> to vector<8x256xf32>
    %93 = vector.extract_strided_slice %75 {offsets = [0, 18], sizes = [8, 256], strides = [1, 1]} : vector<8x290xf32> to vector<8x256xf32>
    %cst_32 = arith.constant 0.000000e+00 : f32
    %94 = vector.shape_cast %20 : vector<1x256xi1> to vector<1x256xi1>
    %95 = vector.broadcast %94 : vector<1x256xi1> to vector<8x256xi1>
    %96 = vector.broadcast %cst_32 : f32 to vector<8x256xf32>
    %97 = arith.select %95, %93, %96 : vector<8x256xi1>, vector<8x256xf32>
    %98 = vector.extract_strided_slice %75 {offsets = [0, 32], sizes = [8, 256], strides = [1, 1]} : vector<8x290xf32> to vector<8x256xf32>
    %cst_33 = arith.constant 0.000000e+00 : f32
    %99 = vector.shape_cast %18 : vector<1x256xi1> to vector<1x256xi1>
    %100 = vector.broadcast %99 : vector<1x256xi1> to vector<8x256xi1>
    %101 = vector.broadcast %cst_33 : f32 to vector<8x256xf32>
    %102 = arith.select %100, %98, %101 : vector<8x256xi1>, vector<8x256xf32>
    %103 = vector.extract_strided_slice %75 {offsets = [0, 33], sizes = [8, 256], strides = [1, 1]} : vector<8x290xf32> to vector<8x256xf32>
    %104 = vector.extract_strided_slice %75 {offsets = [0, 34], sizes = [8, 256], strides = [1, 1]} : vector<8x290xf32> to vector<8x256xf32>
    %cst_34 = arith.constant 0.000000e+00 : f32
    %105 = vector.shape_cast %20 : vector<1x256xi1> to vector<1x256xi1>
    %106 = vector.broadcast %105 : vector<1x256xi1> to vector<8x256xi1>
    %107 = vector.broadcast %cst_34 : f32 to vector<8x256xf32>
    %108 = arith.select %106, %104, %107 : vector<8x256xi1>, vector<8x256xf32>
    %109 = tpu.concatenate %80, %81, %86, %91, %92, %97, %102, %103, %108 in 0 : vector<8x256xf32>, vector<8x256xf32>, vector<8x256xf32>, vector<8x256xf32>, vector<8x256xf32>, vector<8x256xf32>, vector<8x256xf32>, vector<8x256xf32>, vector<8x256xf32> -> vector<72x256xf32>
    %110 = arith.truncf %109 : vector<72x256xf32> to vector<72x256xbf16>
    %c0_35 = arith.constant 0 : index
    %c0_36 = arith.constant 0 : index
    %111 = vector.load %arg4[%c0_35, %c0_36] : memref<4x72xbf16, #tpu.memory_space<vmem>>, vector<4x72xbf16>
    %cst_37 = arith.constant dense<0.000000e+00> : vector<4x256xf32>
    %112 = tpu.matmul %111, %110, %cst_37 {dimension_numbers = #tpu.dot_dimension_numbers<[1], [0], [0], [1], [0, 0, 1, 1], [], []>} : vector<4x72xbf16>, vector<72x256xbf16>, vector<4x256xf32> -> vector<4x256xf32>
    %c0_38 = arith.constant 0 : index
    %c0_39 = arith.constant 0 : index
    %113 = vector.load %arg7[%c0_38, %c0_39] : memref<4x1xf32, #tpu.memory_space<vmem>>, vector<4x1xf32>
    %114 = vector.broadcast %113 : vector<4x1xf32> to vector<4x256xf32>
    %115 = arith.addf %112, %114 : vector<4x256xf32>
    %cst_40 = arith.constant 0.000000e+00 : f32
    %116 = vector.broadcast %cst_40 : f32 to vector<4x256xf32>
    %117 = arith.maximumf %115, %116 : vector<4x256xf32>
    %c8 = arith.constant 8 : index
    %c0_41 = arith.constant 0 : index
    %118 = vector.load %arg13[%c8, %c0_41] : memref<16x256xf32, #tpu.memory_space<vmem>>, vector<4x256xf32>
    tpu.vector_store %arg13[%c8, %c0_41], %117 {strides = array<i32>} : memref<16x256xf32, #tpu.memory_space<vmem>>, vector<4x256xf32>,
    %c0_42 = arith.constant 0 : index
    %c0_43 = arith.constant 0 : index
    %119 = vector.load %arg13[%c0_42, %c0_43] : memref<16x256xf32, #tpu.memory_space<vmem>>, vector<12x256xf32>
    %cst_44 = arith.constant 0.000000e+00 : f32
    %120 = vector.broadcast %cst_44 : f32 to vector<12x17xf32>
    %121 = tpu.concatenate %120, %119, %120 in 1 : vector<12x17xf32>, vector<12x256xf32>, vector<12x17xf32> -> vector<12x290xf32>
    %122 = vector.extract_strided_slice %121 {offsets = [0, 0], sizes = [12, 256], strides = [1, 1]} : vector<12x290xf32> to vector<12x256xf32>
    %cst_45 = arith.constant 0.000000e+00 : f32
    %123 = vector.shape_cast %18 : vector<1x256xi1> to vector<1x256xi1>
    %124 = vector.broadcast %123 : vector<1x256xi1> to vector<12x256xi1>
    %125 = vector.broadcast %cst_45 : f32 to vector<12x256xf32>
    %126 = arith.select %124, %122, %125 : vector<12x256xi1>, vector<12x256xf32>
    %127 = vector.extract_strided_slice %121 {offsets = [0, 1], sizes = [12, 256], strides = [1, 1]} : vector<12x290xf32> to vector<12x256xf32>
    %128 = vector.extract_strided_slice %121 {offsets = [0, 2], sizes = [12, 256], strides = [1, 1]} : vector<12x290xf32> to vector<12x256xf32>
    %cst_46 = arith.constant 0.000000e+00 : f32
    %129 = vector.shape_cast %20 : vector<1x256xi1> to vector<1x256xi1>
    %130 = vector.broadcast %129 : vector<1x256xi1> to vector<12x256xi1>
    %131 = vector.broadcast %cst_46 : f32 to vector<12x256xf32>
    %132 = arith.select %130, %128, %131 : vector<12x256xi1>, vector<12x256xf32>
    %133 = vector.extract_strided_slice %121 {offsets = [0, 16], sizes = [12, 256], strides = [1, 1]} : vector<12x290xf32> to vector<12x256xf32>
    %cst_47 = arith.constant 0.000000e+00 : f32
    %134 = vector.shape_cast %18 : vector<1x256xi1> to vector<1x256xi1>
    %135 = vector.broadcast %134 : vector<1x256xi1> to vector<12x256xi1>
    %136 = vector.broadcast %cst_47 : f32 to vector<12x256xf32>
    %137 = arith.select %135, %133, %136 : vector<12x256xi1>, vector<12x256xf32>
    %138 = vector.extract_strided_slice %121 {offsets = [0, 17], sizes = [12, 256], strides = [1, 1]} : vector<12x290xf32> to vector<12x256xf32>
    %139 = vector.extract_strided_slice %121 {offsets = [0, 18], sizes = [12, 256], strides = [1, 1]} : vector<12x290xf32> to vector<12x256xf32>
    %cst_48 = arith.constant 0.000000e+00 : f32
    %140 = vector.shape_cast %20 : vector<1x256xi1> to vector<1x256xi1>
    %141 = vector.broadcast %140 : vector<1x256xi1> to vector<12x256xi1>
    %142 = vector.broadcast %cst_48 : f32 to vector<12x256xf32>
    %143 = arith.select %141, %139, %142 : vector<12x256xi1>, vector<12x256xf32>
    %144 = vector.extract_strided_slice %121 {offsets = [0, 32], sizes = [12, 256], strides = [1, 1]} : vector<12x290xf32> to vector<12x256xf32>
    %cst_49 = arith.constant 0.000000e+00 : f32
    %145 = vector.shape_cast %18 : vector<1x256xi1> to vector<1x256xi1>
    %146 = vector.broadcast %145 : vector<1x256xi1> to vector<12x256xi1>
    %147 = vector.broadcast %cst_49 : f32 to vector<12x256xf32>
    %148 = arith.select %146, %144, %147 : vector<12x256xi1>, vector<12x256xf32>
    %149 = vector.extract_strided_slice %121 {offsets = [0, 33], sizes = [12, 256], strides = [1, 1]} : vector<12x290xf32> to vector<12x256xf32>
    %150 = vector.extract_strided_slice %121 {offsets = [0, 34], sizes = [12, 256], strides = [1, 1]} : vector<12x290xf32> to vector<12x256xf32>
    %cst_50 = arith.constant 0.000000e+00 : f32
    %151 = vector.shape_cast %20 : vector<1x256xi1> to vector<1x256xi1>
    %152 = vector.broadcast %151 : vector<1x256xi1> to vector<12x256xi1>
    %153 = vector.broadcast %cst_50 : f32 to vector<12x256xf32>
    %154 = arith.select %152, %150, %153 : vector<12x256xi1>, vector<12x256xf32>
    %155 = tpu.concatenate %126, %127, %132, %137, %138, %143, %148, %149, %154 in 0 : vector<12x256xf32>, vector<12x256xf32>, vector<12x256xf32>, vector<12x256xf32>, vector<12x256xf32>, vector<12x256xf32>, vector<12x256xf32>, vector<12x256xf32>, vector<12x256xf32> -> vector<108x256xf32>
    %156 = arith.truncf %155 : vector<108x256xf32> to vector<108x256xbf16>
    %c0_51 = arith.constant 0 : index
    %c0_52 = arith.constant 0 : index
    %157 = vector.load %arg5[%c0_51, %c0_52] : memref<4x108xbf16, #tpu.memory_space<vmem>>, vector<4x108xbf16>
    %cst_53 = arith.constant dense<0.000000e+00> : vector<4x256xf32>
    %158 = tpu.matmul %157, %156, %cst_53 {dimension_numbers = #tpu.dot_dimension_numbers<[1], [0], [0], [1], [0, 0, 1, 1], [], []>} : vector<4x108xbf16>, vector<108x256xbf16>, vector<4x256xf32> -> vector<4x256xf32>
    %c0_54 = arith.constant 0 : index
    %c0_55 = arith.constant 0 : index
    %159 = vector.load %arg8[%c0_54, %c0_55] : memref<4x1xf32, #tpu.memory_space<vmem>>, vector<4x1xf32>
    %160 = vector.broadcast %159 : vector<4x1xf32> to vector<4x256xf32>
    %161 = arith.addf %158, %160 : vector<4x256xf32>
    %cst_56 = arith.constant 0.000000e+00 : f32
    %162 = vector.broadcast %cst_56 : f32 to vector<4x256xf32>
    %163 = arith.maximumf %161, %162 : vector<4x256xf32>
    %c12 = arith.constant 12 : index
    %c0_57 = arith.constant 0 : index
    %164 = vector.load %arg13[%c12, %c0_57] : memref<16x256xf32, #tpu.memory_space<vmem>>, vector<4x256xf32>
    tpu.vector_store %arg13[%c12, %c0_57], %163 {strides = array<i32>} : memref<16x256xf32, #tpu.memory_space<vmem>>, vector<4x256xf32>,
    %c0_58 = arith.constant 0 : index
    %c0_59 = arith.constant 0 : index
    %165 = vector.load %arg13[%c0_58, %c0_59] : memref<16x256xf32, #tpu.memory_space<vmem>>, vector<16x256xf32>
    %166 = arith.addf %22, %165 : vector<16x256xf32>
    %c0_60 = arith.constant 0 : index
    %c0_61 = arith.constant 0 : index
    %167 = vector.load %arg9[%c0_60, %c0_61] : memref<16x1xf32, #tpu.memory_space<vmem>>, vector<16x1xf32>
    %168 = vector.broadcast %167 : vector<16x1xf32> to vector<16x256xf32>
    %169 = arith.mulf %166, %168 : vector<16x256xf32>
    %c0_62 = arith.constant 0 : index
    %c0_63 = arith.constant 0 : index
    %170 = vector.load %arg10[%c0_62, %c0_63] : memref<16x1xf32, #tpu.memory_space<vmem>>, vector<16x1xf32>
    %171 = vector.broadcast %170 : vector<16x1xf32> to vector<16x256xf32>
    %172 = arith.addf %169, %171 : vector<16x256xf32>
    %cst_64 = arith.constant 0.000000e+00 : f32
    %173 = vector.broadcast %cst_64 : f32 to vector<16x256xf32>
    %174 = arith.cmpf oge, %172, %173 : vector<16x256xf32>
    %c0_65 = arith.constant 0 : index
    %c0_66 = arith.constant 0 : index
    %175 = vector.load %arg11[%c0_65, %c0_66] : memref<16x1xf32, #tpu.memory_space<vmem>>, vector<16x1xf32>
    %176 = vector.broadcast %175 : vector<16x1xf32> to vector<16x256xf32>
    %177 = arith.mulf %172, %176 : vector<16x256xf32>
    %178 = arith.select %174, %172, %177 : vector<16x256xi1>, vector<16x256xf32>
    %c0_67 = arith.constant 0 : index
    %c0_68 = arith.constant 0 : index
    %c0_69 = arith.constant 0 : index
    %179 = vector.load %arg12[%c0_67, %c0_68, %c0_69] : memref<1x16x256xf32, #tpu.memory_space<vmem>>, vector<1x16x256xf32>
    %180 = vector.shape_cast %179 : vector<1x16x256xf32> to vector<16x256xf32>
    %181 = vector.shape_cast %178 : vector<16x256xf32> to vector<1x16x256xf32>
    tpu.vector_store %arg12[%c0_67, %c0_68, %c0_69], %181 {strides = array<i32>} : memref<1x16x256xf32, #tpu.memory_space<vmem>>, vector<1x16x256xf32>,
    return
  }
  func.func @transform_0(%arg0: i32) -> (i32, i32, i32) {
    %c0_i32 = arith.constant 0 : i32
    %c0_i32_0 = arith.constant 0 : i32
    %c0_i32_1 = arith.constant 0 : i32
    return %arg0, %c0_i32, %c0_i32_0 : i32, i32, i32
  }
  func.func @transform_1(%arg0: i32) -> (i32, i32) {
    %c0_i32 = arith.constant 0 : i32
    %c0_i32_0 = arith.constant 0 : i32
    %c0_i32_1 = arith.constant 0 : i32
    return %c0_i32, %c0_i32_0 : i32, i32
  }
  func.func @transform_2(%arg0: i32) -> (i32, i32) {
    %c0_i32 = arith.constant 0 : i32
    %c0_i32_0 = arith.constant 0 : i32
    %c0_i32_1 = arith.constant 0 : i32
    return %c0_i32, %c0_i32_0 : i32, i32
  }
  func.func @transform_3(%arg0: i32) -> (i32, i32) {
    %c0_i32 = arith.constant 0 : i32
    %c0_i32_0 = arith.constant 0 : i32
    %c0_i32_1 = arith.constant 0 : i32
    return %c0_i32, %c0_i32_0 : i32, i32
  }
  func.func @transform_4(%arg0: i32) -> (i32, i32) {
    %c0_i32 = arith.constant 0 : i32
    %c0_i32_0 = arith.constant 0 : i32
    %c0_i32_1 = arith.constant 0 : i32
    return %c0_i32, %c0_i32_0 : i32, i32
  }
  func.func @transform_5(%arg0: i32) -> (i32, i32) {
    %c0_i32 = arith.constant 0 : i32
    %c0_i32_0 = arith.constant 0 : i32
    %c0_i32_1 = arith.constant 0 : i32
    return %c0_i32, %c0_i32_0 : i32, i32
  }
  func.func @transform_6(%arg0: i32) -> (i32, i32) {
    %c0_i32 = arith.constant 0 : i32
    %c0_i32_0 = arith.constant 0 : i32
    %c0_i32_1 = arith.constant 0 : i32
    return %c0_i32, %c0_i32_0 : i32, i32
  }
  func.func @transform_7(%arg0: i32) -> (i32, i32) {
    %c0_i32 = arith.constant 0 : i32
    %c0_i32_0 = arith.constant 0 : i32
    %c0_i32_1 = arith.constant 0 : i32
    return %c0_i32, %c0_i32_0 : i32, i32
  }
  func.func @transform_8(%arg0: i32) -> (i32, i32) {
    %c0_i32 = arith.constant 0 : i32
    %c0_i32_0 = arith.constant 0 : i32
    %c0_i32_1 = arith.constant 0 : i32
    return %c0_i32, %c0_i32_0 : i32, i32
  }
  func.func @transform_9(%arg0: i32) -> (i32, i32) {
    %c0_i32 = arith.constant 0 : i32
    %c0_i32_0 = arith.constant 0 : i32
    %c0_i32_1 = arith.constant 0 : i32
    return %c0_i32, %c0_i32_0 : i32, i32
  }
  func.func @transform_10(%arg0: i32) -> (i32, i32) {
    %c0_i32 = arith.constant 0 : i32
    %c0_i32_0 = arith.constant 0 : i32
    %c0_i32_1 = arith.constant 0 : i32
    return %c0_i32, %c0_i32_0 : i32, i32
  }
  func.func @transform_11(%arg0: i32) -> (i32, i32, i32) {
    %c0_i32 = arith.constant 0 : i32
    %c0_i32_0 = arith.constant 0 : i32
    %c0_i32_1 = arith.constant 0 : i32
    return %arg0, %c0_i32, %c0_i32_0 : i32, i32, i32
  }
}

</mosaic_0001>

<bundles_post_ra>
// kernel: tpu_custom_call.1
= control target key start
LH: loop header
LB: loop body
LE: loop exit
PB: predicated region body
PF: predicated region fallthrough
CT: control target
= control target key end

     0   :  { %s2401_s0 = inlined_call_operand.vmem [shape: f32[2,16,256], index: 0, kind: input, shape index: {}]   ;;  %s2402_s1 = inlined_call_operand.vmem [shape: bf16[4,16], index: 1, kind: input, shape index: {}]   ;;  %s2403_s2 = inlined_call_operand.vmem [shape: bf16[4,36], index: 2, kind: input, shape index: {}]   ;;  %s2404_s3 = inlined_call_operand.vmem [shape: bf16[4,72], index: 3, kind: input, shape index: {}]   ;;  %s2405_s4 = inlined_call_operand.vmem [shape: bf16[4,108], index: 4, kind: input, shape index: {}]   ;;  %s2406_s5 = inlined_call_operand.vmem [shape: f32[4,1], index: 5, kind: input, shape index: {}]   ;;  %s2407_s6 = inlined_call_operand.vmem [shape: f32[4,1], index: 6, kind: input, shape index: {}]   ;;  %s2408_s7 = inlined_call_operand.vmem [shape: f32[4,1], index: 7, kind: input, shape index: {}]   ;;  %s2409_s8 = inlined_call_operand.vmem [shape: f32[16,1], index: 8, kind: input, shape index: {}]   ;;  %s2410_s9 = inlined_call_operand.vmem [shape: f32[16,1], index: 9, kind: input, shape index: {}]   ;;  %s2411_s10 = inlined_call_operand.vmem [shape: f32[16,1], index: 10, kind: input, shape index: {}]   ;;  %s2412_s11 = inlined_call_operand.hbm [shape: f32[2,16,256], index: 11, kind: output, shape index: {}]  }
   0x1   :  { %2431 = sst [smem:[#allocation6_spill]] %s2401_s0 }
   0x2   :  { %16 = vsyncpa [#allocation4], 0 }
   0x3   :  { %18 = vsyncpa [#allocation4 + $0x1], 0  ;;  %s1842_s17 = smov 0   ;;  %s1844_s18 = smov 0  }
   0x4   :  { %s1846_s19 = smov 0   ;;  %s1848_s20 = smov 0  }
   0x5 LB: > { %s1863_s21 = sadd.s32 4294967295, %s1766_s20   ;;  %s1363_s22 = sadd.s32 4294967294, %s1766_s20   ;;  %s1766_s20 = sphi %s1848_s20, %s2493_s20   ;;  %s1762_s19 = sphi %s1846_s19, %s2492_s19   ;;  %s1758_s18 = sphi %s1844_s18, %s2491_s18   ;;  %s1754_s17 = sphi %s1842_s17, %s2490_s17  }
   0x6   : > { %s1867_s23 = sadd.s32 1, %s1766_s20   ;;  %s267_s24 = sadd.s32 1, %s1762_s19 }
   0x7   : > { %s264_s25 = ssub.s32 %s1766_s20, %s1867_s23  ;;  %p277_p0 = scmp.ne.s32.totalorder %s1762_s19, %s1758_s18 }
   0x8   : > { %p265_p1 = scmp.eq.s32.totalorder %s264_s25, 0  ;;  %p278_p2 = scmp.eq.s32.totalorder %s1863_s21, 1 }
   0x9   : > { %p283_p3 = scmp.ne.s32.totalorder %s1758_s18, %s1754_s17  ;;  %p284_p4 = scmp.eq.s32.totalorder %s1363_s22, 1 }
   0xa   : > { %s1878_s26 = scalar_select %p265_p1, %s1762_s19, %s267_s24  }
   0xb   : > { %p1880_p5 = por %p278_p2, %p277_p0  ;;  %p1884_p6 = por %p284_p4, %p283_p3 }
   0xc   : > { %p1366_p7 = scmp.ge.s32.totalorder %s1766_s20, 1  ;;  %p340_p8 = scmp.lt.s32.totalorder %s1766_s20, 3 }
   0xe   : > { %p341_p9 = pnand %p1366_p7, %p340_p8 }
   0xf   : > { %p380_p10 = scmp.lt.s32.totalorder (!%p341_p9), %s1863_s21, 1  ;;  %v1768_v0 = vmov (!%p341_p9), 0   ;;  %s2434_s0 = sld [smem:[#allocation6_spill]] (!%p341_p9)  ;;  %v421_v7 = vld [vmem:[%s2402_s1] sm:$0x3] (!%p341_p9)  ;;  %vm424_vm0 = vcmask (!%p341_p9), 130048   ;;  %v386_v28 = vlaneseq (!%p341_p9) }
  0x10   : > { %344 = sbr.rel (%p341_p9) target bundleno = 1787 (0x6fb), region = 64  ;;  %460 = vmatprep.mubr.bf16.mxu1 (!%p341_p9), %v1768_v0  ;;  %676 = vmatprep.mubr.bf16.mxu0 (!%p341_p9), %v1768_v0  ;;  %s2417_s22 = smov (!%p341_p9), 17   ;;  %vm479_vm1 = vcmask (!%p341_p9), 138240   ;;  %v627_v27 = vld [vmem:[%s2406_s5] sm:$0xf] (!%p341_p9)  ;;  %vm2423_vm2 = vcmask (!%p341_p9), 916480  }
  0x11   : > { %1523 = vset.pattern.permute.xlu1 (!%p341_p9), %v1768_v0  ;;  %1699 = vset.pattern.permute.xlu0 (!%p341_p9), %v1768_v0  ;;  %s1770_s24 = smov (!%p341_p9), 126   ;;  %s2415_s25 = smov (!%p341_p9), 112   ;;  %v387_v31 = vand.u32 (!%p341_p9), 127, %v386_v28  ;;  %vm543_vm4 = vcmask (!%p341_p9), 785408   ;;  %vm2424_vm5 = vcmask (!%p341_p9), 1031168   ;;  %vm589_vm9 = vcmask (!%p341_p9), 908288  }
  0x12   : > { %s1774_s12 = smov (!%p341_p9), 111   ;;  %s2419_s13 = smov (!%p341_p9), 127   ;;  %vm530_vm10 = vcmask (!%p341_p9), 900096   ;;  %vm2426_vm11 = vcmask (!%p341_p9), 777216   ;;  %vm2421_vm12 = vcmask (!%p341_p9), 1043456   ;;  %vm2422_vm13 = vcmask (!%p341_p9), 1039360  }
  0x13   : > { %s2427_s15 = smov (!%p341_p9), 95   ;;  %s1777_s16 = smov (!%p341_p9), 94   ;;  %v388_v34 = vadd.s32 (!%p341_p9), 128, %v387_v31  ;;  %v393_v38 = vand.u32 (!%p341_p9), 15, %v387_v31  ;;  %vm2425_vm14 = vcmask (!%p341_p9), 769024   ;;  %vm637_vm15 = vcmask (!%p341_p9), 1041408  }
  0x15   : > { %v400_v37 = vand.u32 (!%p341_p9), 15, %v388_v34  ;;  %vm1952_vm6 = vcmp.ne.s32.totalorder (!%p341_p9), %v393_v38, 0  ;;  %vm1958_vm7 = vcmp.ne.s32.totalorder (!%p341_p9), %v393_v38, 15 }
  0x17   : > { %s381_s29 = scalar_select %p380_p10, %s1863_s21, 1  ;;  %vm1948_vm3 = vcmp.ne.s32.totalorder %v400_v37, 0  ;;  %vm1962_vm8 = vcmp.ne.s32.totalorder %v400_v37, 15 }
  0x19   : > { %s1424_s30 = sshll.u32 %s381_s29, 5  ;;  %s1772_s29 = smov 110  }
  0x1a   : > { %s1899_s14 = scalar_lea.vmem %s2434_s0, %s1424_s30  ;;  %s2413_s30 = smov 96  }
  0x1b   : > { %v418_v1 = vld [vmem:[%s1899_s14 + $0x8] sm:$0xff]  ;;  %v420_v2 = vld [vmem:[%s1899_s14 + $0x18] sm:$0xff]  ;;  %v417_v3 = vld [vmem:[%s1899_s14] sm:$0xff]  ;;  %s377_s0 = sand.u32 1, %s1758_s18  }
  0x1c   : > { %v423_v4 = vpack.c.bf16 %v420_v2, %v418_v1  ;;  %v419_v5 = vld [vmem:[%s1899_s14 + $0x10] sm:$0xff]  ;;  %v1701_v49 = vld [vmem:[%s1899_s14 + $0x8] sm:$0xff] }
  0x1d   : > { %v422_v6 = vpack.c.bf16 %v419_v5, %v417_v3 }
  0x1e   : > { %428 = vmatprep.subr.bf16.mxu1 %v423_v4 }
  0x1f   : > { %429 = vmatpush1.bf16.msra.mxu1 %v422_v6 }
  0x22   : > { %1370 = vmatmul.mubr.msk.bf16.vlgmr.msra.gmra.mrb[0].mxu1 %vm424_vm0, %v421_v7  ;;  %vm633_vm0 = vcmask 293888  }
  0x23   : > { %1200 = vmatprep.mubr.bf16.mxu1 %v1768_v0 }
  0xf5   : > { %v462_v8 = vpop.f32.mrb[0].mxu1 }
  0xf6   : > { %469 = vst [vmem:[#allocation2] sm:$0xf] %v462_v8  ;;  %v464_v9 = vpop.f32.mrb[1].mxu1 }
  0xf7   : > { %470 = vst [vmem:[#allocation2 + $0x8] sm:$0xf] %v464_v9  ;;  %v466_v10 = vpop.f32.mrb[2].mxu1 }
  0xf8   : > { %v467_v11 = vpop.f32.mrb[3].mxu1 }
  0xfd   : > { %v471_v12 = vld [vmem:[#allocation2] sm:$0xf] }
  0xfe   : > { %v472_v13 = vld [vmem:[#allocation2 + $0x8] sm:$0xf] }
  0xff   : > { %v1478_v14 = vpack.i.bf16 %v472_v13, %v471_v12 }
 0x101   : > { %1479 = vrot.lane.b32.xlu0 %v1478_v14, %s2417_s22 }
 0x173   : > { %v1480_v15 = vpop.permute.xlu0 %1479 }
 0x174   : > { %v1482_v16 = vunpack.i.h.bf16 %v1480_v15  ;;  %v1481_v17 = vunpack.i.l.bf16 %v1480_v15 }
 0x176   : > { %v485_v18 = vsel %vm479_vm1, %v1482_v16, 0.0  ;;  %v1912_v19 = vsel %vm479_vm1, %v1481_v17, %v1482_v16  ;;  %v1915_v20 = vsel %vm479_vm1, 0.0, %v1481_v17 }
 0x177   : > { %498 = vrot.lane.b32.xlu0 %v1915_v20, %s1770_s24  ;;  %511 = vrot.lane.b32.xlu1 %v1915_v20, %s2415_s25  ;;  %v1488_v21 = vpack.i.bf16 %v485_v18, %v1912_v19  ;;  %v563_v22 = vrot.slane %v1915_v20, 4  ;;  %v564_v23 = vrot.slane %v1912_v19, 4  ;;  %v565_v24 = vrot.slane %v485_v18, 4 }
 0x178   : > { %v1513_v26 = vpack.i.bf16 %v1912_v19, %v1915_v20  ;;  %v491_v53 = vsel %vm1948_vm3, %v1912_v19, 0.0  ;;  %v490_v61 = vsel %vm1952_vm6, %v1915_v20, 0.0 }
 0x179   : > { %v1508_v25 = vpack.i.bf16 %v565_v24, %v564_v23 }
 0x17b   : > { %524 = vrot.lane.b32.xlu0 %v1915_v20, %s1772_s29  ;;  %1489 = vrot.lane.b32.xlu1 %v1488_v21, %s1770_s24 }
 0x17f   : > { %537 = vrot.lane.b32.xlu0 %v1915_v20, %s2413_s30  ;;  %1499 = vrot.lane.b32.xlu1 %v1488_v21, %s2413_s30  ;;  %s2444_s30 = smov 96  }
 0x183   : > { %1504 = vrot.lane.b32.xlu1 %v1488_v21, %s1774_s12  ;;  %1484 = vrot.lane.b32.xlu0 %v1488_v21, %s2415_s25  ;;  %s2443_s25 = smov 112  }
 0x187   : > { %566 = vrot.lane.b32.xlu1 %v563_v22, %s2419_s13  ;;  %1494 = vrot.lane.b32.xlu0 %v1488_v21, %s1772_s29 }
 0x18b   : > { %600 = vrot.lane.b32.xlu0 %v563_v22, %s2427_s15  ;;  %1509 = vrot.lane.b32.xlu1 %v1508_v25, %s2419_s13 }
 0x18f   : > { %1519 = vrot.lane.b32.xlu0 %v1508_v25, %s2427_s15  ;;  %583 = vrot.lane.b32.xlu1 %v1915_v20, %s1774_s12 }
 0x193   : > { %554 = vrot.lane.b32.xlu0 %v485_v18, %s1777_s16  ;;  %1514 = vrot.lane.b32.xlu1 %v1513_v26, %s1777_s16 }
 0x197   : > { %630 = vperm.xlu1 %1523, %v627_v27  }
 0x1e9   : > { %v499_v29 = vpop.permute.xlu0 %498  ;;  %v512_v30 = vpop.permute.xlu1 %511 }
 0x1ed   : > { %v525_v32 = vpop.permute.xlu0 %524  ;;  %v1490_v33 = vpop.permute.xlu1 %1489 }
 0x1ee   : > { %v1492_v42 = vunpack.i.h.bf16 %v1490_v33  ;;  %v1491_v43 = vunpack.i.l.bf16 %v1490_v33 }
 0x1f0   : > { %v506_v57 = vsel %vm2424_vm5, %v1491_v43, %v1492_v42  ;;  %v505_v62 = vsel %vm2424_vm5, %v499_v29, %v1491_v43 }
 0x1f1   : > { %v538_v35 = vpop.permute.xlu0 %537  ;;  %v1500_v36 = vpop.permute.xlu1 %1499  ;;  %v510_v5 = vsel %vm1962_vm8, %v506_v57, 0.0  ;;  %v509_v10 = vsel %vm1958_vm7, %v505_v62, 0.0  ;;  %v626_v57 = vld [vmem:[%s2403_s2] sm:$0x3] }
 0x1f2   : > { %v1502_v59 = vunpack.i.h.bf16 %v1500_v36  ;;  %v1501_v60 = vunpack.i.l.bf16 %v1500_v36 }
 0x1f4   : > { %v544_v11 = vsel %vm543_vm4, %v538_v35, %v1501_v60  ;;  %v545_v12 = vsel %vm543_vm4, %v1501_v60, %v1502_v59 }
 0x1f5   : > { %v1946_v39 = vpop.permute.xlu1 %1504  ;;  %v1485_v40 = vpop.permute.xlu0 %1484  ;;  %v549_v31 = vsel %vm1948_vm3, %v545_v12, 0.0  ;;  %v548_v35 = vsel %vm1952_vm6, %v544_v11, 0.0 }
 0x1f6   : > { %v1487_v44 = vunpack.i.h.bf16 %v1485_v40  ;;  %v1486_v45 = vunpack.i.l.bf16 %v1485_v40  ;;  %v1507_v13 = vunpack.i.h.bf16 %v1946_v39  ;;  %v1506_v14 = vunpack.i.l.bf16 %v1946_v39 }
 0x1f8   : > { %v518_v47 = vsel %vm2423_vm2, %v512_v30, %v1486_v45  ;;  %v519_v48 = vsel %vm2423_vm2, %v1486_v45, %v1487_v44 }
 0x1f9   : > { %v567_v51 = vpop.permute.xlu1 %566  ;;  %v1495_v52 = vpop.permute.xlu0 %1494  ;;  %v523_v54 = vsel %vm1948_vm3, %v519_v48, 0.0  ;;  %v522_v58 = vsel %vm1952_vm6, %v518_v47, 0.0 }
 0x1fa   : > { %v1497_v55 = vunpack.i.h.bf16 %v1495_v52  ;;  %v1496_v56 = vunpack.i.l.bf16 %v1495_v52  ;;  %v580_v1 = vrot.slane %v523_v54, 4  ;;  %v579_v6 = vrot.slane %v522_v58, 4 }
 0x1fc   : > { %v532_v63 = vsel %vm530_vm10, %v1496_v56, %v1497_v55  ;;  %v531_v2 = vsel %vm530_vm10, %v525_v32, %v1496_v56  ;;  %v615_v17 = vsel %vm2421_vm12, %v510_v5, %v580_v1  ;;  %v614_v24 = vsel %vm2421_vm12, %v509_v10, %v579_v6 }
 0x1fd   : > { %v601_v3 = vpop.permute.xlu0 %600  ;;  %v1510_v4 = vpop.permute.xlu1 %1509  ;;  %v536_v7 = vsel %vm1962_vm8, %v532_v63, 0.0  ;;  %v535_v15 = vsel %vm1958_vm7, %v531_v2, 0.0  ;;  %v591_v32 = vsel %vm589_vm9, %v1506_v14, %v1507_v13 }
 0x1fe   : > { %v1512_v8 = vunpack.i.h.bf16 %v1510_v4  ;;  %v1511_v9 = vunpack.i.l.bf16 %v1510_v4  ;;  %v597_v19 = vrot.slane %v536_v7, 4  ;;  %v596_v29 = vrot.slane %v535_v15, 4 }
 0x200   : > { %v574_v16 = vsel %vm2422_vm13, %v1511_v9, %v1512_v8  ;;  %v573_v18 = vsel %vm2422_vm13, %v567_v51, %v1511_v9  ;;  %v617_v38 = vsel %vm2421_vm12, %v591_v32, %v597_v19 }
 0x201   : > { %v1520_v20 = vpop.permute.xlu0 %1519  ;;  %v584_v21 = vpop.permute.xlu1 %583  ;;  %v613_v22 = vsel %vm2421_vm12, %v491_v53, %v574_v16  ;;  %v612_v23 = vsel %vm2421_vm12, %v490_v61, %v573_v18  ;;  %v814_v16 = vld [vmem:[%s2407_s6] sm:$0xf] }
 0x202   : > { %v1522_v25 = vunpack.i.h.bf16 %v1520_v20  ;;  %v1521_v26 = vunpack.i.l.bf16 %v1520_v20  ;;  %v590_v27 = vsel %vm589_vm9, %v584_v21, %v1506_v14  ;;  %v621_v28 = vpack.c.bf16 %v615_v17, %v613_v22 }
 0x203   : > { %v620_v30 = vpack.c.bf16 %v614_v24, %v612_v23  ;;  %v616_v36 = vsel %vm2421_vm12, %v590_v27, %v596_v29 }
 0x204   : > { %v607_v33 = vsel %vm2426_vm11, %v601_v3, %v1521_v26  ;;  %v608_v34 = vsel %vm2426_vm11, %v1521_v26, %v1522_v25  ;;  %644 = vmatprep.subr.bf16.mxu0 %v621_v28 }
 0x205   : > { %v1515_v37 = vpop.permute.xlu1 %1514  ;;  %645 = vmatpush1.bf16.msra.mxu0 %v620_v30  ;;  %v619_v39 = vsel %vm2421_vm12, %v549_v31, %v608_v34  ;;  %v618_v40 = vsel %vm2421_vm12, %v548_v35, %v607_v33  ;;  %v555_v47 = vpop.permute.xlu0 %554 }
 0x206   : > { %v1517_v42 = vunpack.i.h.bf16 %v1515_v37  ;;  %v1516_v43 = vunpack.i.l.bf16 %v1515_v37  ;;  %v623_v44 = vpack.c.bf16 %v619_v39, %v617_v38  ;;  %v622_v45 = vpack.c.bf16 %v618_v40, %v616_v36 }
 0x208   : > { %v558_v48 = vsel %vm2425_vm14, %v1517_v42, %v555_v47  ;;  %646 = vmatprep.subr.bf16.mxu0 %v623_v44  ;;  %v557_v51 = vsel %vm2425_vm14, %v1516_v43, %v1517_v42 }
 0x209   : > { %v562_v52 = vsel %vm1962_vm8, %v558_v48, 0.0  ;;  %647 = vmatpush1.bf16.msra.mxu0 %v622_v45  ;;  %v561_v53 = vsel %vm1958_vm7, %v557_v51, 0.0 }
 0x20a   : > { %v625_v54 = vpack.c.bf16 %v562_v52, %v562_v52  ;;  %v624_v55 = vpack.c.bf16 %v561_v53, %v561_v53 }
 0x20c   : > { %1371 = vmatprep.subr.msk.bf16.mxu0 %vm637_vm15, %v625_v54  ;;  %v639_v56 = vsel %vm637_vm15, %v624_v55, 0  ;;  %vm2429_vm15 = vmmov 1  }
 0x20d   : > { %649 = vmatpush1.bf16.msra.mxu0 %v639_v56  ;;  %vm2062_vm12 = vmpackc.low %vm2429_vm15, %vm1952_vm6 }
 0x210   : > { %1372 = vmatmul.mubr.msk.bf16.vlgmr.msra.gmra.mrb[0].mxu0 %vm633_vm0, %v626_v57  ;;  %vm2055_vm0 = vmpackc.low %vm2429_vm15, %vm1948_vm3 }
 0x211   : > { %862 = vmatprep.mubr.bf16.mxu0 %v1768_v0 }
 0x216   : > { %v631_v58 = vpop.permute.xlu1 %630 }
 0x2e3   : > { %v678_v59 = vpop.f32.mrb[0].mxu0 }
 0x2e4   : > { %v679_v60 = vadd.f32 %v678_v59, %v631_v58  ;;  %v680_v61 = vpop.f32.mrb[1].mxu0 }
 0x2e5   : > { %v681_v62 = vadd.f32 %v680_v61, %v631_v58  ;;  %v682_v63 = vpop.f32.mrb[2].mxu0 }
 0x2e6   : > { %v685_v1 = vmax.f32 %v679_v60, 0.0  ;;  %v683_v2 = vpop.f32.mrb[3].mxu0 }
 0x2e7   : > { %v686_v3 = vmax.f32 %v681_v62, 0.0 }
 0x2e8   : > { %v689_v4 = vrot.slane %v685_v1, 4 }
 0x2e9   : > { %v690_v5 = vrot.slane %v686_v3, 4 }
 0x2ea   : > { %693 = vst [vmem:[#allocation2] sm:$0xf0] %v689_v4 }
 0x2eb   : > { %694 = vst [vmem:[#allocation2 + $0x8] sm:$0xf0] %v690_v5 }
 0x2f1   : > { %v2020_v6 = vld [vmem:[#allocation2] sm:$0xff] }
 0x2f2   : > { %v2022_v7 = vld [vmem:[#allocation2 + $0x8] sm:$0xff] }
 0x2f3   : > { %v1524_v0 = vpack.i.bf16 %v2022_v7, %v2020_v6 }
 0x2f5   : > { %1525 = vrot.lane.b32.xlu0 %v1524_v0, %s2417_s22  ;;  %s1367_s22 = sshll.u32 %s377_s0, 5 }
 0x367   : > { %v1526_v8 = vpop.permute.xlu0 %1525 }
 0x368   : > { %v1527_v9 = vunpack.i.l.bf16 %v1526_v8  ;;  %v1528_v11 = vunpack.i.h.bf16 %v1526_v8 }
 0x36a   : > { %v707_v10 = vsel %vm479_vm1, 0.0, %v1527_v9  ;;  %v708_v12 = vsel %vm479_vm1, %v1528_v11, 0.0  ;;  %v703_v13 = vsel %vm479_vm1, %v1527_v9, %v1528_v11 }
 0x36b   : > { %713 = vrot.lane.b32.xlu1 %v707_v10, %s1770_s24  ;;  %773 = vrot.lane.b32.xlu0 %v707_v10, %s2419_s13  ;;  %v1529_v14 = vpack.i.bf16 %v708_v12, %v703_v13  ;;  %v1564_v15 = vpack.i.bf16 %v703_v13, %v707_v10 }
 0x36f   : > { %737 = vrot.lane.b32.xlu1 %v707_v10, %s1772_s29  ;;  %725 = vrot.lane.b32.xlu0 %v707_v10, %s2443_s25 }
 0x373   : > { %749 = vrot.lane.b32.xlu1 %v707_v10, %s2444_s30  ;;  %783 = vrot.lane.b32.xlu0 %v707_v10, %s1774_s12 }
 0x377   : > { %793 = vrot.lane.b32.xlu0 %v707_v10, %s2427_s15  ;;  %1530 = vrot.lane.b32.xlu1 %v1529_v14, %s2419_s13  ;;  %s2445_s13 = smov 17  }
 0x37b   : > { %1540 = vrot.lane.b32.xlu0 %v1529_v14, %s2443_s25  ;;  %1535 = vrot.lane.b32.xlu1 %v1529_v14, %s1770_s24 }
 0x37f   : > { %1550 = vrot.lane.b32.xlu0 %v1529_v14, %s1774_s12  ;;  %1545 = vrot.lane.b32.xlu1 %v1529_v14, %s1772_s29 }
 0x383   : > { %1560 = vrot.lane.b32.xlu0 %v1529_v14, %s2427_s15  ;;  %1555 = vrot.lane.b32.xlu1 %v1529_v14, %s2444_s30  ;;  %s2456_s15 = smov 127  }
 0x387   : > { %765 = vrot.lane.b32.xlu0 %v708_v12, %s1777_s16  ;;  %1565 = vrot.lane.b32.xlu1 %v1564_v15, %s1777_s16 }
 0x38b   : > { %1570 = vrot.lane.b32.xlu0 %v1524_v0, %s2445_s13  ;;  %817 = vperm.xlu1 %1523, %v814_v16  }
 0x3dd   : > { %v714_v17 = vpop.permute.xlu1 %713  ;;  %v774_v18 = vpop.permute.xlu0 %773 }
 0x3e1   : > { %v738_v19 = vpop.permute.xlu1 %737  ;;  %v726_v20 = vpop.permute.xlu0 %725 }
 0x3e5   : > { %v750_v21 = vpop.permute.xlu1 %749  ;;  %v784_v22 = vpop.permute.xlu0 %783 }
 0x3e9   : > { %v794_v23 = vpop.permute.xlu0 %793  ;;  %v1531_v24 = vpop.permute.xlu1 %1530 }
 0x3ea   : > { %v1533_v25 = vunpack.i.h.bf16 %v1531_v24  ;;  %v1532_v26 = vunpack.i.l.bf16 %v1531_v24 }
 0x3ec   : > { %v779_v27 = vsel %vm2422_vm13, %v774_v18, %v1532_v26  ;;  %v780_v28 = vsel %vm2422_vm13, %v1532_v26, %v1533_v25  ;;  %vm1379_vm13 = vmpackc.low %vm1948_vm3, %vm1962_vm8 }
 0x3ed   : > { %v1374_v30 = vpack.c.bf16 %v780_v28, %v703_v13  ;;  %v1377_v31 = vpack.c.bf16 %v779_v27, %v707_v10  ;;  %v1541_v32 = vpop.permute.xlu0 %1540  ;;  %v1536_v33 = vpop.permute.xlu1 %1535 }
 0x3ee   : > { %v1543_v35 = vunpack.i.h.bf16 %v1541_v32  ;;  %v1542_v36 = vunpack.i.l.bf16 %v1541_v32  ;;  %v1538_v37 = vunpack.i.h.bf16 %v1536_v33  ;;  %v1537_v38 = vunpack.i.l.bf16 %v1536_v33 }
 0x3ef   : > { %1375 = vmatprep.subr.msk.bf16.mxu0 %vm2055_vm0, %v1374_v30  ;;  %v813_v30 = vld [vmem:[%s2404_s3] sm:$0x3] }
 0x3f0   : > { %v731_v39 = vsel %vm2423_vm2, %v726_v20, %v1542_v36  ;;  %v732_v40 = vsel %vm2423_vm2, %v1542_v36, %v1543_v35  ;;  %v719_v42 = vsel %vm2424_vm5, %v714_v17, %v1537_v38  ;;  %v720_v43 = vsel %vm2424_vm5, %v1537_v38, %v1538_v37  ;;  %1378 = vmatpush1.bf16.msk.msra.mxu0 %vm2062_vm12, %v1377_v31  ;;  %vm1382_vm2 = vmpackc.low %vm1952_vm6, %vm1958_vm7 }
 0x3f1   : > { %v1380_v44 = vpack.c.bf16 %v732_v40, %v720_v43  ;;  %v1383_v45 = vpack.c.bf16 %v731_v39, %v719_v42  ;;  %v1551_v47 = vpop.permute.xlu0 %1550  ;;  %v1546_v48 = vpop.permute.xlu1 %1545  ;;  %vm2089_vm5 = vmpackc.low %vm1962_vm8, %vm2429_vm15 }
 0x3f2   : > { %v1553_v51 = vunpack.i.h.bf16 %v1551_v47  ;;  %v1552_v52 = vunpack.i.l.bf16 %v1551_v47  ;;  %v1548_v53 = vunpack.i.h.bf16 %v1546_v48  ;;  %v1547_v54 = vunpack.i.l.bf16 %v1546_v48 }
 0x3f3   : > { %1381 = vmatprep.subr.msk.bf16.mxu0 %vm1379_vm13, %v1380_v44  ;;  %vm2096_vm13 = vmpackc.low %vm1958_vm7, %vm2429_vm15 }
 0x3f4   : > { %v789_v55 = vsel %vm589_vm9, %v784_v22, %v1552_v52  ;;  %v790_v56 = vsel %vm589_vm9, %v1552_v52, %v1553_v51  ;;  %v743_v57 = vsel %vm530_vm10, %v738_v19, %v1547_v54  ;;  %v744_v58 = vsel %vm530_vm10, %v1547_v54, %v1548_v53  ;;  %1384 = vmatpush1.bf16.msk.msra.mxu0 %vm1382_vm2, %v1383_v45 }
 0x3f5   : > { %v1386_v60 = vpack.c.bf16 %v744_v58, %v790_v56  ;;  %v1389_v61 = vpack.c.bf16 %v743_v57, %v789_v55  ;;  %v1561_v62 = vpop.permute.xlu0 %1560  ;;  %v1556_v63 = vpop.permute.xlu1 %1555  ;;  %vm2454_vm2 = vcmask 1043456  }
 0x3f6   : > { %v1563_v2 = vunpack.i.h.bf16 %v1561_v62  ;;  %v1562_v3 = vunpack.i.l.bf16 %v1561_v62  ;;  %v1558_v4 = vunpack.i.h.bf16 %v1556_v63  ;;  %v1557_v5 = vunpack.i.l.bf16 %v1556_v63 }
 0x3f7   : > { %1387 = vmatprep.subr.msk.bf16.mxu0 %vm2089_vm5, %v1386_v60 }
 0x3f8   : > { %v799_v0 = vsel %vm2426_vm11, %v794_v23, %v1562_v3  ;;  %v800_v8 = vsel %vm2426_vm11, %v1562_v3, %v1563_v2  ;;  %v755_v9 = vsel %vm543_vm4, %v750_v21, %v1557_v5  ;;  %v756_v10 = vsel %vm543_vm4, %v1557_v5, %v1558_v4  ;;  %1390 = vmatpush1.bf16.msk.msra.mxu0 %vm2096_vm13, %v1389_v61 }
 0x3f9   : > { %v1392_v11 = vpack.c.bf16 %v800_v8, %v756_v10  ;;  %v1395_v12 = vpack.c.bf16 %v799_v0, %v755_v9  ;;  %v766_v13 = vpop.permute.xlu0 %765  ;;  %v1566_v14 = vpop.permute.xlu1 %1565  ;;  %vm820_vm11 = vcmask 588800  }
 0x3fa   : > { %v1568_v15 = vunpack.i.h.bf16 %v1566_v14  ;;  %v1567_v16 = vunpack.i.l.bf16 %v1566_v14 }
 0x3fb   : > { %1393 = vmatprep.subr.msk.bf16.mxu0 %vm2055_vm0, %v1392_v11 }
 0x3fc   : > { %v768_v17 = vsel %vm2425_vm14, %v1568_v15, %v766_v13  ;;  %v767_v18 = vsel %vm2425_vm14, %v1567_v16, %v1568_v15  ;;  %1396 = vmatpush1.bf16.msk.msra.mxu0 %vm2062_vm12, %v1395_v12  ;;  %vm2455_vm14 = vmmov %vm2454_vm2 }
 0x3fd   : > { %v772_v19 = vsel %vm1962_vm8, %v768_v17, 0.0  ;;  %v1571_v20 = vpop.permute.xlu0 %1570  ;;  %v771_v21 = vsel %vm1958_vm7, %v767_v18, 0.0 }
 0x3fe   : > { %v1573_v22 = vunpack.i.h.bf16 %v1571_v20  ;;  %v1572_v23 = vunpack.i.l.bf16 %v1571_v20  ;;  %v812_v24 = vpack.c.bf16 %v772_v19, %v772_v19  ;;  %v811_v25 = vpack.c.bf16 %v771_v21, %v771_v21  ;;  %v1227_v20 = vld [vmem:[%s2409_s8] sm:$0xff] }
 0x400   : > { %v2119_v26 = vsel %vm479_vm1, %v1573_v22, 0.0  ;;  %v2122_v27 = vsel %vm479_vm1, %v1572_v23, %v1573_v22  ;;  %1397 = vmatprep.subr.msk.bf16.mxu0 %vm2454_vm2, %v812_v24  ;;  %v825_v28 = vsel %vm2455_vm14, %v811_v25, 0  ;;  %v2147_v58 = vsel %vm479_vm1, 0.0, %v1572_v23  ;;  %vm2458_vm14 = vmmov %vm2454_vm2  ;;  %v1151_v22 = vld [vmem:[%s2408_s7] sm:$0xf]  ;;  %v1228_v23 = vld [vmem:[%s2409_s8 + $0x8] sm:$0xff] }
 0x401   : > { %839 = vmatpush1.bf16.msra.mxu0 %v825_v28  ;;  %v1032_v31 = vrot.slane %v2122_v27, 4  ;;  %v1033_v32 = vrot.slane %v2119_v26, 4  ;;  %v1584_v35 = vpack.i.bf16 %v2119_v26, %v2122_v27  ;;  %v1031_v13 = vrot.slane %v2147_v58, 4  ;;  %v1243_v24 = vld [vmem:[%s2410_s9] sm:$0xff]  ;;  %v1244_v25 = vld [vmem:[%s2410_s9 + $0x8] sm:$0xff] }
 0x402   : > { %v1674_v19 = vpack.i.bf16 %v2122_v27, %v2147_v58 }
 0x403   : > { %v2131_v33 = vpack.i.bf16 %v1033_v32, %v1032_v31 }
 0x404   : > { %1398 = vmatmul.mubr.msk.bf16.vlgmr.msra.gmra.mrb[4].mxu0 %vm820_vm11, %v813_v30  ;;  %vm2457_vm11 = vcmask 1039360  }
 0x405   : > { %1580 = vrot.lane.b32.xlu0 %v2131_v33, %s2456_s15 }
 0x409   : > { %1585 = vrot.lane.b32.xlu0 %v1584_v35, %s1770_s24 }
 0x40a   : > { %v818_v36 = vpop.permute.xlu1 %817 }
 0x477   : > { %v2142_v52 = vpop.permute.xlu0 %1580 }
 0x478   : > { %v1583_v53 = vunpack.i.h.bf16 %v2142_v52  ;;  %v1582_v54 = vunpack.i.l.bf16 %v2142_v52 }
 0x47a   : > { %v1053_v62 = vsel %vm2457_vm11, %v1582_v54, %v1583_v53 }
 0x4d7   : > { %v864_v37 = vpop.f32.mrb[4].mxu0 }
 0x4d8   : > { %v865_v38 = vadd.f32 %v864_v37, %v818_v36  ;;  %v866_v39 = vpop.f32.mrb[5].mxu0 }
 0x4d9   : > { %v867_v40 = vadd.f32 %v866_v39, %v818_v36  ;;  %v868_v42 = vpop.f32.mrb[6].mxu0 }
 0x4da   : > { %v871_v43 = vmax.f32 %v865_v38, 0.0  ;;  %v869_v44 = vpop.f32.mrb[7].mxu0 }
 0x4db   : > { %v872_v45 = vmax.f32 %v867_v40, 0.0 }
 0x4dc   : > { %873 = vst [vmem:[#allocation2 + $0x10] sm:$0xf] %v871_v43 }
 0x4dd   : > { %874 = vst [vmem:[#allocation2 + $0x18] sm:$0xf] %v872_v45 }
 0x4e3   : > { %v877_v47 = vld [vmem:[#allocation2 + $0x10] sm:$0xf] }
 0x4e4   : > { %v878_v48 = vld [vmem:[#allocation2 + $0x18] sm:$0xf] }
 0x4e5   : > { %v1574_v51 = vpack.i.bf16 %v878_v48, %v877_v47 }
 0x4e7   : > { %1575 = vrot.lane.b32.xlu1 %v1574_v51, %s2445_s13 }
 0x4eb   : > { %1590 = vrot.lane.b32.xlu1 %v1584_v35, %s2443_s25 }
 0x4ef   : > { %1595 = vrot.lane.b32.xlu1 %v1584_v35, %s1772_s29 }
 0x4f3   : > { %1600 = vrot.lane.b32.xlu1 %v1584_v35, %s1774_s12 }
 0x559   : > { %v1576_v55 = vpop.permute.xlu1 %1575 }
 0x55a   : > { %v1578_v56 = vunpack.i.h.bf16 %v1576_v55  ;;  %v1577_v57 = vunpack.i.l.bf16 %v1576_v55 }
 0x55c   : > { %v892_v60 = vsel %vm479_vm1, %v1577_v57, %v1578_v56  ;;  %v2151_v61 = vsel %vm479_vm1, 0.0, %v1577_v57  ;;  %v902_v4 = vsel %vm479_vm1, %v1578_v56, 0.0  ;;  %vm2459_vm1 = vmmov %vm2454_vm2 }
 0x55d   : > { %v1609_v63 = vpack.i.bf16 %v2147_v58, %v2151_v61  ;;  %v1604_v2 = vpack.i.bf16 %v2151_v61, %v2147_v58  ;;  %v906_v3 = vsel %vm1948_vm3, %v892_v60, 0.0  ;;  %v1036_v8 = vrot.slane %v892_v60, 4  ;;  %vm2460_vm11 = vmmov %vm2459_vm1  ;;  %v1591_v28 = vpop.permute.xlu1 %1590 }
 0x55e   : > { %v1129_v5 = vsel %vm2458_vm14, %v906_v3, %v1053_v62  ;;  %v1634_v9 = vpack.i.bf16 %v902_v4, %v892_v60  ;;  %v1034_v11 = vrot.slane %v2151_v61, 4  ;;  %v1038_v12 = vrot.slane %v902_v4, 4 }
 0x55f   : > { %1610 = vrot.lane.b32.xlu0 %v1609_v63, %s1774_s12  ;;  %1605 = vrot.lane.b32.xlu1 %v1604_v2, %s2443_s25  ;;  %v1400_v0 = vpack.c.bf16 %v1129_v5, %v2122_v27  ;;  %v1037_v10 = vsel %vm2454_vm2, %v1032_v31, %v1036_v8  ;;  %v1619_v14 = vpack.i.bf16 %v892_v60, %v2147_v58  ;;  %v1264_v27 = vld [vmem:[%s2411_s10 + $0x8] sm:$0xff]  ;;  %v1586_v31 = vpop.permute.xlu0 %1585  ;;  %v905_v8 = vsel %vm1952_vm6, %v2151_v61, 0.0 }
 0x560   : > { %v1644_v15 = vpack.i.bf16 %v1037_v10, %v1031_v13  ;;  %v1035_v16 = vsel %vm2459_vm1, %v1031_v13, %v1034_v11  ;;  %v1039_v29 = vsel %vm2460_vm11, %v1033_v32, %v1038_v12  ;;  %v1624_v17 = vpack.i.bf16 %v2151_v61, %v902_v4 }
 0x561   : > { %1401 = vmatprep.subr.msk.bf16.mxu1 %vm2055_vm0, %v1400_v0  ;;  %v1649_v18 = vpack.i.bf16 %v1035_v16, %v1039_v29  ;;  %v1689_v21 = vpack.i.bf16 %v2151_v61, %v2119_v26  ;;  %v1263_v26 = vld [vmem:[%s2411_s10] sm:$0xff]  ;;  %v2219_v30 = vpop.permute.xlu1 %1595  ;;  %vm2462_vm0 = vcmask 916480   ;;  %v1588_v45 = vunpack.i.h.bf16 %v1586_v31 }
 0x562   : > { %v1598_v39 = vunpack.i.h.bf16 %v2219_v30  ;;  %v1597_v40 = vunpack.i.l.bf16 %v2219_v30  ;;  %v1587_v47 = vunpack.i.l.bf16 %v1586_v31  ;;  %vm2463_vm14 = vmmov %vm2462_vm0  ;;  %vm2466_vm11 = vcmask 1031168  }
 0x563   : > { %1635 = vrot.lane.b32.xlu1 %v1634_v9, %s1774_s12  ;;  %1615 = vrot.lane.b32.xlu0 %v1634_v9, %s2443_s25  ;;  %s2461_s12 = smov 95   ;;  %vm2464_vm2 = vmmov %vm2462_vm0  ;;  %s1779_s25 = smov [#allocation3]  }
 0x564   : > { %v972_v56 = vsel %vm530_vm10, %v1597_v40, %v1598_v39  ;;  %vm2465_vm1 = vmmov %vm2462_vm0  ;;  %v924_v5 = vsel %vm2466_vm11, %v1587_v47, %v1588_v45 }
 0x565   : > { %v2221_v32 = vpop.permute.xlu1 %1600 }
 0x566   : > { %v1603_v10 = vunpack.i.h.bf16 %v2221_v32  ;;  %v1602_v11 = vunpack.i.l.bf16 %v2221_v32 }
 0x567   : > { %1620 = vrot.lane.b32.xlu0 %v1619_v14, %s1770_s24  ;;  %1645 = vrot.lane.b32.xlu1 %v1644_v15, %s2456_s15 }
 0x568   : > { %v1087_v59 = vsel %vm589_vm9, %v1602_v11, %v1603_v10 }
 0x56b   : > { %1625 = vrot.lane.b32.xlu0 %v1624_v17, %s1770_s24  ;;  %1650 = vrot.lane.b32.xlu1 %v1649_v18, %s2456_s15 }
 0x56f   : > { %1630 = vrot.lane.b32.xlu0 %v1619_v14, %s1772_s29  ;;  %1655 = vrot.lane.b32.xlu1 %v1584_v35, %s2444_s30  ;;  %v1592_v35 = vunpack.i.l.bf16 %v1591_v28 }
 0x573   : > { %1640 = vrot.lane.b32.xlu0 %v1624_v17, %s1772_s29  ;;  %1665 = vrot.lane.b32.xlu1 %v1624_v17, %s2444_s30 }
 0x577   : > { %1660 = vrot.lane.b32.xlu0 %v1619_v14, %s2444_s30  ;;  %1675 = vrot.lane.b32.xlu1 %v1674_v19, %s1777_s16  ;;  %s1708_s30 = sshll.u32 %s1779_s25, 4  ;;  %s1709_s30 = int_to_ptr.vmem [resolvable:$false] %s1708_s30 }
 0x57b   : > { %1670 = vrot.lane.b32.xlu0 %v2131_v33, %s2461_s12  ;;  %1680 = vrot.lane.b32.xlu1 %v1644_v15, %s2461_s12  ;;  %v1593_v33 = vunpack.i.h.bf16 %v1591_v28 }
 0x57d   : > { %v948_v38 = vsel %vm2462_vm0, %v1592_v35, %v1593_v33  ;;  %vm2467_vm0 = vcmask 1039360  }
 0x57e   : > { %v956_v51 = vsel %vm1948_vm3, %v948_v38, 0.0  ;;  %vm2472_vm15 = vmmov %vm2467_vm0 }
 0x57f   : > { %1685 = vrot.lane.b32.xlu0 %v1649_v18, %s2461_s12  ;;  %1695 = vrot.lane.b32.xlu1 %v1634_v9, %s1777_s16  ;;  %v1065_v0 = vrot.slane %v956_v51, 4  ;;  %v980_v9 = vsel %vm1962_vm8, %v972_v56, 0.0  ;;  %s2341_s12 = scalar_lea.vmem [#allocation3], %s1367_s22  ;;  %s1710_s22 = scalar_lea.vmem %s1709_s30, 1024 }
 0x580   : > { %v1099_v39 = vrot.slane %v980_v9, 4  ;;  %s1301_s24 = sshll.u32 %s2341_s12, 4  ;;  %s2349_s24 = int_to_ptr.vmem [resolvable:$true] %s1301_s24 }
 0x581   : > { %s1704_s15 = scalar_lea.vmem %s2349_s24, 512  ;;  %p1711_p0 = scmp.lt.s32.totalorder %s2349_s24, %s1709_s30 }
 0x582   : > { %p1705_p11 = scmp.ne.s32.totalorder %s2349_s24, %s1704_s15  ;;  %p1712_p1 = scmp.lt.s32.totalorder %s1710_s22, %s1704_s15 }
 0x583   : > { %1690 = vrot.lane.b32.xlu0 %v1689_v21, %s1777_s16  ;;  %1231 = vperm.xlu1 %1523, %v1227_v20   ;;  %s1425_s16 = sshll.u32 %s1863_s21, 9  ;;  %s2360_s21 = scalar_lea.sflag [#allocation4], %s377_s0 }
 0x584   : > { %s2354_s13 = scalar_lea.hbm %s2412_s11, %s1425_s16  ;;  %p1706_p12 = pnand %p1705_p11, %p1880_p5 }
 0x585   : > { %p1713_p2 = por %p1712_p1, %p1711_p0 }
 0x586   : > { %p1707_p13 = pneg %p1706_p12 }
 0x587   : > { %1154 = vperm.xlu0 %1699, %v1151_v22   ;;  %1236 = vperm.xlu1 %1523, %v1228_v23  }
 0x588   : > { %p1714_p3 = pnand %p1713_p2, %p1707_p13 }
 0x58b   : > { %1247 = vperm.xlu0 %1699, %v1243_v24   ;;  %1252 = vperm.xlu1 %1523, %v1244_v25  }
 0x58f   : > { %1267 = vperm.xlu0 %1699, %v1263_v26   ;;  %1272 = vperm.xlu1 %1523, %v1264_v27  }
 0x5d1   : > { %v2223_v36 = vpop.permute.xlu0 %1610  ;;  %v1606_v37 = vpop.permute.xlu1 %1605 }
 0x5d2   : > { %v1607_v42 = vunpack.i.l.bf16 %v1606_v37  ;;  %v1608_v53 = vunpack.i.h.bf16 %v1606_v37 }
 0x5d4   : > { %v947_v57 = vsel %vm2463_vm14, %v1607_v42, %v1592_v35  ;;  %vm2468_vm14 = vcmask 1043456  }
 0x5d5   : > { %v2228_v43 = vpop.permute.xlu1 %1635  ;;  %v1616_v44 = vpop.permute.xlu0 %1615  ;;  %v955_v13 = vsel %vm1952_vm6, %v947_v57, 0.0  ;;  %v1612_v57 = vunpack.i.l.bf16 %v2223_v36 }
 0x5d6   : > { %v1618_v48 = vunpack.i.h.bf16 %v1616_v44  ;;  %v1617_v55 = vunpack.i.l.bf16 %v1616_v44  ;;  %v1638_v60 = vunpack.i.h.bf16 %v2228_v43  ;;  %v1637_v62 = vunpack.i.l.bf16 %v2228_v43 }
 0x5d7   : > { %v1064_v42 = vrot.slane %v955_v13, 4 }
 0x5d8   : > { %v949_v63 = vsel %vm2464_vm2, %v1608_v53, %v1617_v55  ;;  %v950_v2 = vsel %vm2465_vm1, %v1617_v55, %v1618_v48  ;;  %v1089_v61 = vsel %vm589_vm9, %v1637_v62, %v1638_v60  ;;  %vm2469_vm2 = vmmov %vm2466_vm11 }
 0x5d9   : > { %v1621_v3 = vpop.permute.xlu0 %1620  ;;  %v1646_v4 = vpop.permute.xlu1 %1645  ;;  %v957_v14 = vsel %vm1952_vm6, %v949_v63, 0.0  ;;  %v958_v15 = vsel %vm1948_vm3, %v950_v2, 0.0  ;;  %vm2470_vm1 = vmmov %vm2469_vm2 }
 0x5da   : > { %v1647_v12 = vunpack.i.l.bf16 %v1646_v4  ;;  %v1622_v16 = vunpack.i.l.bf16 %v1621_v3  ;;  %v1623_v29 = vunpack.i.h.bf16 %v1621_v3  ;;  %v1648_v17 = vunpack.i.h.bf16 %v1646_v4  ;;  %vm2471_vm11 = vmmov %vm2470_vm1 }
 0x5db   : > { %v1066_v25 = vrot.slane %v957_v14, 4  ;;  %v1068_v26 = vrot.slane %v958_v15, 4 }
 0x5dc   : > { %v1052_v18 = vsel %vm2467_vm0, %v1647_v12, %v1582_v54  ;;  %v923_v30 = vsel %vm2469_vm2, %v1622_v16, %v1587_v47  ;;  %v1613_v47 = vunpack.i.h.bf16 %v2223_v36  ;;  %v1088_v36 = vsel %vm589_vm9, %v1612_v57, %v1637_v62 }
 0x5dd   : > { %v1626_v19 = vpop.permute.xlu0 %1625  ;;  %v1651_v20 = vpop.permute.xlu1 %1650  ;;  %v1128_v21 = vsel %vm2468_vm14, %v905_v8, %v1052_v18 }
 0x5de   : > { %v1628_v22 = vunpack.i.h.bf16 %v1626_v19  ;;  %v1627_v23 = vunpack.i.l.bf16 %v1626_v19  ;;  %v1653_v24 = vunpack.i.h.bf16 %v1651_v20  ;;  %v1403_v27 = vpack.c.bf16 %v1128_v21, %v2147_v58 }
 0x5df   : > { %v1652_v28 = vunpack.i.l.bf16 %v1651_v20  ;;  %v1086_v8 = vsel %vm589_vm9, %v1613_v47, %v1602_v11 }
 0x5e0   : > { %v925_v31 = vsel %vm2470_vm1, %v1628_v22, %v1623_v29  ;;  %v926_v52 = vsel %vm2471_vm11, %v1623_v29, %v1627_v23  ;;  %v1054_v54 = vsel %vm2472_vm15, %v1653_v24, %v1648_v17  ;;  %1404 = vmatpush1.bf16.msk.msra.mxu1 %vm2062_vm12, %v1403_v27  ;;  %vm2473_vm15 = vmmov %vm2468_vm14 }
 0x5e1   : > { %v933_v32 = vsel %vm1958_vm7, %v925_v31, 0.0  ;;  %v1055_v33 = vsel %vm2467_vm0, %v1648_v17, %v1652_v28  ;;  %v1409_v35 = vpack.c.bf16 %v923_v30, %v1054_v54  ;;  %v1631_v37 = vpop.permute.xlu0 %1630  ;;  %v1656_v58 = vpop.permute.xlu1 %1655  ;;  %v934_v38 = vsel %vm1962_vm8, %v926_v52, 0.0  ;;  %vm2474_vm12 = vmmov %vm2468_vm14 }
 0x5e2   : > { %v1406_v44 = vpack.c.bf16 %v924_v5, %v1055_v33  ;;  %v1632_v45 = vunpack.i.l.bf16 %v1631_v37  ;;  %v1069_v48 = vsel %vm2473_vm15, %v1065_v0, %v1068_v26  ;;  %v1131_v51 = vsel %vm2468_vm14, %v934_v38, %v1065_v0  ;;  %vm2475_vm2 = vmmov %vm2474_vm12 }
 0x5e3   : > { %v1141_v34 = vpack.c.bf16 %v1069_v48, %v1131_v51  ;;  %v1130_v55 = vsel %vm2474_vm12, %v933_v32, %v1064_v42  ;;  %v1133_v56 = vsel %vm2475_vm2, %v1089_v61, %v1099_v39  ;;  %vm2476_vm1 = vmmov %vm2475_vm2  ;;  %v1633_v3 = vunpack.i.h.bf16 %v1631_v37 }
 0x5e4   : > { %v971_v53 = vsel %vm530_vm10, %v1632_v45, %v1597_v40  ;;  %1407 = vmatprep.subr.msk.bf16.mxu1 %vm2089_vm5, %v1406_v44  ;;  %v1067_v40 = vsel %vm2476_vm1, %v1064_v42, %v1066_v25  ;;  %v1143_v1 = vpack.c.bf16 %v1133_v56, %v1087_v59  ;;  %v1658_v12 = vunpack.i.h.bf16 %v1656_v58  ;;  %vm2477_vm5 = vmmov %vm2476_vm1 }
 0x5e5   : > { %v979_v60 = vsel %vm1958_vm7, %v971_v53, 0.0  ;;  %1410 = vmatpush1.bf16.msk.msra.mxu1 %vm2096_vm13, %v1409_v35  ;;  %v1641_v63 = vpop.permute.xlu0 %1640  ;;  %v1666_v2 = vpop.permute.xlu1 %1665  ;;  %v1140_v9 = vpack.c.bf16 %v1067_v40, %v1130_v55  ;;  %v1657_v15 = vunpack.i.l.bf16 %v1656_v58  ;;  %vm2478_vm9 = vmmov %vm2476_vm1  ;;  %vm2480_vm13 = vmmov 1  }
 0x5e6   : > { %v1098_v4 = vrot.slane %v979_v60, 4  ;;  %v1643_v5 = vunpack.i.h.bf16 %v1641_v63  ;;  %v1642_v0 = vunpack.i.l.bf16 %v1641_v63  ;;  %1172 = vmatprep.subr.bf16.mxu1 %v1141_v34  ;;  %v1668_v23 = vunpack.i.h.bf16 %v1666_v2  ;;  %vm1411_vm11 = vmpackc.low %vm1948_vm3, %vm2480_vm13 }
 0x5e7   : > { %v996_v22 = vsel %vm543_vm4, %v1657_v15, %v1658_v12  ;;  %v1667_v24 = vunpack.i.l.bf16 %v1666_v2  ;;  %vm1414_vm0 = vmpackc.low %vm1952_vm6, %vm2480_vm13  ;;  %vm2481_vm15 = vcmask 777216   ;;  %vm1157_vm13 = vcmask 883712  }
 0x5e8   : > { %v973_v13 = vsel %vm530_vm10, %v1643_v5, %v1633_v3  ;;  %v974_v14 = vsel %vm530_vm10, %v1633_v3, %v1642_v0  ;;  %v1132_v10 = vsel %vm2477_vm5, %v1088_v36, %v1098_v4  ;;  %vm2479_vm10 = vmmov %vm2476_vm1  ;;  %vm2486_vm5 = vcmask 769024  }
 0x5e9   : > { %v981_v16 = vsel %vm1958_vm7, %v973_v13, 0.0  ;;  %v982_v11 = vsel %vm1962_vm8, %v974_v14, 0.0  ;;  %1173 = vmatpush1.bf16.msra.mxu1 %v1140_v9  ;;  %v1661_v43 = vpop.permute.xlu0 %1660  ;;  %v1676_v61 = vpop.permute.xlu1 %1675  ;;  %v1142_v62 = vpack.c.bf16 %v1132_v10, %v1086_v8  ;;  %vm2482_vm14 = vmmov %vm2481_vm15  ;;  %v1150_v14 = vld [vmem:[%s2405_s4] sm:$0x3] }
 0x5ea   : > { %v1100_v29 = vrot.slane %v981_v16, 4  ;;  %v1102_v17 = vrot.slane %v982_v11, 4  ;;  %v1662_v18 = vunpack.i.l.bf16 %v1661_v43  ;;  %1174 = vmatprep.subr.bf16.mxu1 %v1143_v1  ;;  %v1663_v19 = vunpack.i.h.bf16 %v1661_v43  ;;  %vm2484_vm12 = vmmov %vm2476_vm1 }
 0x5eb   : > { %v1678_v35 = vunpack.i.h.bf16 %v1676_v61  ;;  %v1677_v37 = vunpack.i.l.bf16 %v1676_v61  ;;  %v1224_v11 = vadd.f32 %v1701_v49, %v2022_v7 }
 0x5ec   : > { %v995_v20 = vsel %vm543_vm4, %v1662_v18, %v1657_v15  ;;  %v1101_v21 = vsel %vm2478_vm9, %v1098_v4, %v1100_v29  ;;  %v1103_v27 = vsel %vm2479_vm10, %v1099_v39, %v1102_v17  ;;  %v997_v32 = vsel %vm543_vm4, %v1668_v23, %v1663_v19  ;;  %vm2487_vm9 = vmmov %vm2486_vm5  ;;  %v1700_v15 = vld [vmem:[%s1899_s14] sm:$0xff] }
 0x5ed   : > { %1175 = vmatpush1.bf16.msra.mxu1 %v1142_v62  ;;  %v1671_v25 = vpop.permute.xlu0 %1670  ;;  %v1681_v26 = vpop.permute.xlu1 %1680  ;;  %v1415_v28 = vpack.c.bf16 %v995_v20, %v1101_v21  ;;  %v1412_v54 = vpack.c.bf16 %v996_v22, %v1103_v27  ;;  %v998_v33 = vsel %vm543_vm4, %v1663_v19, %v1667_v24  ;;  %v1005_v53 = vsel %vm1952_vm6, %v997_v32, 0.0  ;;  %vm2483_vm4 = vmmov %vm2482_vm14 }
 0x5ee   : > { %v1673_v30 = vunpack.i.h.bf16 %v1671_v25  ;;  %v1672_v31 = vunpack.i.l.bf16 %v1671_v25  ;;  %v1682_v52 = vunpack.i.l.bf16 %v1681_v26  ;;  %v1683_v38 = vunpack.i.h.bf16 %v1681_v26  ;;  %vm2485_vm2 = vmmov %vm2483_vm4 }
 0x5ef   : > { %1413 = vmatprep.subr.msk.bf16.mxu1 %vm1411_vm11, %v1412_v54  ;;  %v1006_v34 = vsel %vm1948_vm3, %v998_v33, 0.0  ;;  %v1019_v59 = vsel %vm2486_vm5, %v1677_v37, %v1678_v35  ;;  %vm2488_vm6 = vmmov %vm2486_vm5  ;;  %vm1161_vm10 = vcmask 1045504   ;;  %v1223_v16 = vadd.f32 %v1700_v15, %v2020_v6 }
 0x5f0   : > { %v1121_v58 = vsel %vm2481_vm15, %v1672_v31, %v1673_v30  ;;  %v1120_v39 = vsel %vm2482_vm14, %v1682_v52, %v1672_v31  ;;  %vm2489_vm3 = vmmov %vm2486_vm5  ;;  %v1027_v36 = vsel %vm1958_vm7, %v1019_v59, 0.0 }
 0x5f1   : > { %v1686_v42 = vpop.permute.xlu0 %1685  ;;  %v1696_v44 = vpop.permute.xlu1 %1695  ;;  %1416 = vmatpush1.bf16.msk.msra.mxu1 %vm1414_vm0, %v1415_v28  ;;  %v1134_v56 = vsel %vm2484_vm12, %v1005_v53, %v1120_v39  ;;  %v1135_v60 = vsel %vm2476_vm1, %v1006_v34, %v1121_v58  ;;  %v1703_v58 = vld [vmem:[%s1899_s14 + $0x18] sm:$0xff] }
 0x5f2   : > { %v1688_v45 = vunpack.i.h.bf16 %v1686_v42  ;;  %v1687_v47 = vunpack.i.l.bf16 %v1686_v42  ;;  %v1698_v48 = vunpack.i.h.bf16 %v1696_v44  ;;  %v1697_v51 = vunpack.i.l.bf16 %v1696_v44 }
 0x5f4   : > { %v1122_v55 = vsel %vm2483_vm4, %v1688_v45, %v1683_v38  ;;  %v1123_v57 = vsel %vm2485_vm2, %v1683_v38, %v1687_v47  ;;  %v1022_v3 = vsel %vm2487_vm9, %v1697_v51, %v1698_v48 }
 0x5f5   : > { %v1146_v63 = vpack.c.bf16 %v1122_v55, %v1134_v56  ;;  %v1691_v2 = vpop.permute.xlu0 %1690  ;;  %v1147_v40 = vpack.c.bf16 %v1123_v57, %v1135_v60  ;;  %v1030_v0 = vsel %vm1962_vm8, %v1022_v3, 0.0 }
 0x5f6   : > { %v1693_v46 = vunpack.i.h.bf16 %v1691_v2  ;;  %v1692_v4 = vunpack.i.l.bf16 %v1691_v2 }
 0x5f7   : > { %1178 = vmatprep.subr.bf16.mxu1 %v1147_v40 }
 0x5f8   : > { %v1020_v41 = vsel %vm2488_vm6, %v1678_v35, %v1692_v4  ;;  %v1021_v5 = vsel %vm2489_vm3, %v1693_v46, %v1697_v51  ;;  %1179 = vmatpush1.bf16.msra.mxu1 %v1146_v63  ;;  %v1702_v35 = vld [vmem:[%s1899_s14 + $0x10] sm:$0xff] }
 0x5f9   : > { %v1028_v8 = vsel %vm1962_vm8, %v1020_v41, 0.0  ;;  %v1029_v9 = vsel %vm1958_vm7, %v1021_v5, 0.0 }
 0x5fa   : > { %v1149_v1 = vpack.c.bf16 %v1030_v0, %v1028_v8  ;;  %v1148_v12 = vpack.c.bf16 %v1029_v9, %v1027_v36 }
 0x5fc   : > { %1417 = vmatprep.subr.msk.bf16.mxu1 %vm1161_vm10, %v1149_v1  ;;  %v1163_v13 = vsel %vm1161_vm10, %v1148_v12, 0 }
 0x5fd   : > { %1181 = vmatpush1.bf16.msra.mxu1 %v1163_v13 }
 0x600   : > { %1418 = vmatmul.mubr.msk.bf16.vlgmr.msra.gmra.mrb[4].mxu1 %vm1157_vm13, %v1150_v14 }
 0x602   : > { %v1232_v10 = vpop.permute.xlu1 %1231 }
 0x603   : > { %v1239_v43 = vmul.f32 %v1232_v10, %v1223_v16  ;;  %v1240_v61 = vmul.f32 %v1232_v10, %v1224_v11 }
 0x606   : > { %v1155_v50 = vpop.permute.xlu0 %1154  ;;  %v1237_v52 = vpop.permute.xlu1 %1236 }
 0x60a   : > { %v1248_v62 = vpop.permute.xlu0 %1247  ;;  %v1253_v54 = vpop.permute.xlu1 %1252 }
 0x60b   : > { %v1255_v29 = vadd.f32 %v1248_v62, %v1239_v43  ;;  %v1256_v17 = vadd.f32 %v1248_v62, %v1240_v61 }
 0x60d   : > { %vm1259_vm7 = vcmp.ge.f32.partialorder %v1255_v29, 0.0  ;;  %vm1260_vm8 = vcmp.ge.f32.partialorder %v1256_v17, 0.0 }
 0x60e   : > { %v1268_v18 = vpop.permute.xlu0 %1267  ;;  %v1273_v45 = vpop.permute.xlu1 %1272 }
 0x60f   : > { %v1275_v19 = vmul.f32 %v1268_v18, %v1255_v29  ;;  %v1276_v20 = vmul.f32 %v1268_v18, %v1256_v17 }
 0x611   : > { %v1279_v21 = vsel %vm1259_vm7, %v1255_v29, %v1275_v19  ;;  %v1280_v22 = vsel %vm1260_vm8, %v1256_v17, %v1276_v20 }
 0x612   : > { %1283 = vst [vmem:[%s2341_s12] sm:$0xff] %v1279_v21  ;;  %1284 = vst [vmem:[%s2341_s12 + $0x8] sm:$0xff] %v1280_v22 }
 0x6d3   : > { %v1202_v6 = vpop.f32.mrb[4].mxu1 }
 0x6d4   : > { %v1203_v7 = vadd.f32 %v1202_v6, %v1155_v50  ;;  %v1204_v23 = vpop.f32.mrb[5].mxu1 }
 0x6d5   : > { %v1205_v24 = vadd.f32 %v1204_v23, %v1155_v50  ;;  %v1206_v25 = vpop.f32.mrb[6].mxu1 }
 0x6d6   : > { %v1209_v26 = vmax.f32 %v1203_v7, 0.0  ;;  %v1207_v27 = vpop.f32.mrb[7].mxu1 }
 0x6d7   : > { %v1210_v28 = vmax.f32 %v1205_v24, 0.0 }
 0x6d8   : > { %v1213_v30 = vrot.slane %v1209_v26, 4 }
 0x6d9   : > { %v1214_v31 = vrot.slane %v1210_v28, 4 }
 0x6da   : > { %1217 = vst [vmem:[#allocation2 + $0x10] sm:$0xf0] %v1213_v30 }
 0x6db   : > { %1218 = vst [vmem:[#allocation2 + $0x18] sm:$0xf0] %v1214_v31 }
 0x6e1   : > { %v1221_v32 = vld [vmem:[#allocation2 + $0x10] sm:$0xff] }
 0x6e2   : > { %v1222_v33 = vld [vmem:[#allocation2 + $0x18] sm:$0xff]  ;;  %v1225_v37 = vadd.f32 %v1702_v35, %v1221_v32 }
 0x6e3   : > { %v1226_v38 = vadd.f32 %v1703_v58, %v1222_v33 }
 0x6e4   : > { %v1241_v39 = vmul.f32 %v1237_v52, %v1225_v37 }
 0x6e5   : > { %v1242_v42 = vmul.f32 %v1237_v52, %v1226_v38 }
 0x6e6   : > { %v1257_v44 = vadd.f32 %v1253_v54, %v1241_v39 }
 0x6e7   : > { %v1258_v47 = vadd.f32 %v1253_v54, %v1242_v42 }
 0x6e8   : > { %vm1261_vm11 = vcmp.ge.f32.partialorder %v1257_v44, 0.0  ;;  %v1277_v48 = vmul.f32 %v1273_v45, %v1257_v44 }
 0x6e9   : > { %vm1262_vm0 = vcmp.ge.f32.partialorder %v1258_v47, 0.0  ;;  %v1278_v51 = vmul.f32 %v1273_v45, %v1258_v47 }
 0x6ea   : > { %v1281_v53 = vsel %vm1261_vm11, %v1257_v44, %v1277_v48 }
 0x6eb   : > { %v1282_v34 = vsel %vm1262_vm0, %v1258_v47, %v1278_v51  ;;  %1285 = vst [vmem:[%s2341_s12 + $0x10] sm:$0xff] %v1281_v53 }
 0x6ec   : > { %1286 = vst [vmem:[%s2341_s12 + $0x18] sm:$0xff] %v1282_v34 }
 0x6ed   : > { %1717 = shalt.err (!%p1714_p3)
}
 0x6ee   : > { %s1718_s0 = scalar_lea.hbm %s2354_s13, 512  ;;  %s1722_s14 = scalar_lea.hbm %s2412_s11, 1024 }
 0x6ef   : > { %p1719_p4 = scmp.ne.s32.totalorder %s2354_s13, %s1718_s0  ;;  %p1723_p9 = scmp.lt.u32.totalorder %s2354_s13, %s2412_s11 }
 0x6f0   : > { %p1724_p10 = scmp.lt.u32.totalorder %s1722_s14, %s1718_s0  ;;  %p1726_p12 = scmp.lt.u32.totalorder %s1718_s0, %s2354_s13 }
 0x6f1   : > { %p1720_p7 = pnand %p1719_p4, %p1880_p5 }
 0x6f2   : > { %p1725_p11 = por %p1724_p10, %p1723_p9 }
 0x6f3   : > { %p1721_p8 = pneg %p1720_p7 }
 0x6f4   : > { %p1727_p13 = por %p1726_p12, %p1725_p11 }
 0x6f6   : > { %p1728_p0 = pnand %p1727_p13, %p1721_p8 }
 0x6f8   : > { %1731 = shalt.err (!%p1728_p0)
}
 0x6f9   : > { %s1780_s15 = smov 256   ;;  %s1781_s30 = smov 16  }
 0x6fa   : > { %1426 = dma.vmem_to_hbm [thread:$0]  (%p1880_p5), %s2349_s24, 512, %s2354_s13, %s2360_s21, %s1780_s15, %s1780_s15, %s1781_s30  }
 0x6fb PF: > { %p1432_p1 = scmp.ge.s32.totalorder %s1766_s20, 2  ;;  %s1316_s22 = sand.u32 1, %s1754_s17  }
 0x6fc   : > { %s1317_s0 = scalar_lea.sflag [#allocation4], %s1316_s22 }
 0x6fd   : > { %p1429_p2 = pnand %p1432_p1, %p1884_p6 }
 0x6ff   : > { %1749 = dma.done.wait (!%p1429_p2), %s1317_s0, 512  }
 0x700   : > { %1751 = vsyncadd (!%p1429_p2), %s1317_s0, 4294966784  ;;  %p21_p3 = scmp.ge.s32.totalorder %s1867_s23, 4   ;;  %s2490_s17 = smov %s1758_s18 }
 0x701   : > { %s2491_s18 = smov %s1762_s19  ;;  %s2492_s19 = smov %s1878_s26 }
 0x702   : > { %s2493_s20 = smov %s1867_s23  ;;  %23 = sbr.rel (!%p21_p3) target bundleno = 5 (0x5), region = 99 }
 0x709   :  { %1322 = vsyncpa [#allocation4], 1 }
 0x70a   :  { %1324 = vsyncpa [#allocation4 + $0x1], 1 }

</bundles_post_ra>
